<compile_context>
chip_gen: v7x
topology: tpu7x:2x2x1
jax: 0.10.0
libtpu: 0.0.40
codegen_flags: <defaults>
</compile_context>

<pallas_src>
import functools

import jax
import jax.numpy as jnp
from jax.experimental import pallas as pl
from jax.experimental.pallas import tpu as pltpu


# Explicit scoped-VMEM budget: tiles below are sized to stay well under 32 MiB
# so the kernel fits v7x's 64 MiB physical VMEM as well as v5e/v6e's 128 MiB.
_VMEM_LIMIT_BYTES = 32 * 1024 * 1024
_MAX_ROWS_PER_STEP = 512   # rows (WB * N) handled by one grid step


# ----------------------------------------------------------------------------
# Glue helpers (plain JAX): window partition/reverse, relative position bias
# ----------------------------------------------------------------------------
def window_partition(x, ws):
    # x: (B, H, W, C) -> (B * nW, ws, ws, C)
    B, H, W, C = x.shape
    x = x.reshape(B, H // ws, ws, W // ws, ws, C)
    return x.transpose(0, 1, 3, 2, 4, 5).reshape(-1, ws, ws, C)


def window_reverse(windows, ws, H, W):
    # windows: (B * nW, ws, ws, C) -> (B, H, W, C)
    B = windows.shape[0] // (H * W // ws // ws)
    x = windows.reshape(B, H // ws, W // ws, ws, ws, -1)
    return x.transpose(0, 1, 3, 2, 4, 5).reshape(B, H, W, -1)


def relative_position_bias(table, ws, num_heads):
    # table: ((2*ws-1)^2, num_heads) -> bias (num_heads, N, N), N = ws*ws
    coords = jnp.stack(jnp.meshgrid(jnp.arange(ws), jnp.arange(ws), indexing="ij"))
    cf = coords.reshape(2, -1)                        # (2, N)
    rel = cf[:, :, None] - cf[:, None, :]             # (2, N, N)
    rel = rel.transpose(1, 2, 0)                      # (N, N, 2)
    rel = rel.at[:, :, 0].add(ws - 1)
    rel = rel.at[:, :, 1].add(ws - 1)
    rel = rel.at[:, :, 0].multiply(2 * ws - 1)
    idx = rel.sum(-1)                                 # (N, N)
    N = ws * ws
    bias = table[idx.reshape(-1)].reshape(N, N, num_heads)
    return bias.transpose(2, 0, 1).astype(jnp.float32)  # (nh, N, N)


# ----------------------------------------------------------------------------
# Static tiling choice
# ----------------------------------------------------------------------------
def _choose_window_batch(num_windows, n_tokens):
    """Largest divisor WB of num_windows with WB*N <= 512 rows, prefer >=2 steps."""
    divisors = [wb for wb in range(1, num_windows + 1)
                if num_windows % wb == 0 and wb * n_tokens <= _MAX_ROWS_PER_STEP]
    if not divisors:
        return 1
    multi_step = [wb for wb in divisors if num_windows // wb >= 2]
    return max(multi_step) if multi_step else max(divisors)


# ----------------------------------------------------------------------------
# Fused kernel: window MHSA + residual + LN1 + FFN + residual + LN2
# ----------------------------------------------------------------------------
def fused_encoder_layer(x_windows, p, *, num_heads):
    """Windowed MHSA (rel-pos bias) -> +x -> LN1 -> FFN -> +y1 -> LN2.

    x_windows: (num_windows*B, N, C) f32.  Returns same shape/dtype.
    """
    Bw, N, C = x_windows.shape
    hd = C // num_heads
    F = p["w1"].shape[1]
    WB = _choose_window_batch(Bw, N)
    n_groups = Bw // WB
    eps = 1e-5

    def kernel(x_ref, wq, wk, wv, wo, bq, bk, bv, bo, bias_ref,
               g1, be1, w1, b1, w2, b2, g2, be2, o_ref):
        x3 = x_ref[...]                                   # (WB, N, C) f32
        x2 = x3.reshape(WB * N, C)                        # lane-dense rows for MXU
        xb = x2.astype(jnp.bfloat16)

        # ---- QKV projections over all WB*N rows (scale pre-folded into wq/bq)
        q = jnp.dot(xb, wq[...], preferred_element_type=jnp.float32) + bq[...]
        k = jnp.dot(xb, wk[...], preferred_element_type=jnp.float32) + bk[...]
        v = jnp.dot(xb, wv[...], preferred_element_type=jnp.float32) + bv[...]
        q3 = q.reshape(WB, N, C).astype(jnp.bfloat16)
        k3 = k.reshape(WB, N, C).astype(jnp.bfloat16)
        v3 = v.reshape(WB, N, C).astype(jnp.bfloat16)

        # ---- per-head attention (static, small head count)
        ctx_heads = []
        for h in range(num_heads):
            lo = h * hd
            qh = q3[:, :, lo:lo + hd]
            kh = k3[:, :, lo:lo + hd]
            vh = v3[:, :, lo:lo + hd]
            s = jnp.einsum("wnd,wmd->wnm", qh, kh,
                           preferred_element_type=jnp.float32)     # (WB, N, N)
            s = s + bias_ref[h]                                     # bcast over WB
            s = s - jnp.max(s, axis=-1, keepdims=True)
            e = jnp.exp(s)
            pr = e * pl.reciprocal(jnp.sum(e, axis=-1, keepdims=True), approx=True)
            ctx_heads.append(jnp.einsum("wnm,wmd->wnd",
                                        pr.astype(jnp.bfloat16), vh,
                                        preferred_element_type=jnp.float32))
        ctx = jnp.concatenate(ctx_heads, axis=-1).reshape(WB * N, C)  # full lanes

        # ---- output projection + residual
        attn = jnp.dot(ctx.astype(jnp.bfloat16), wo[...],
                       preferred_element_type=jnp.float32) + bo[...]
        y = attn + x2

        # ---- LayerNorm1 (f32 statistics)
        mu = jnp.mean(y, axis=-1, keepdims=True)
        var = jnp.mean(jnp.square(y - mu), axis=-1, keepdims=True)
        y1 = (y - mu) * jax.lax.rsqrt(var + eps) * g1[...] + be1[...]

        # ---- FFN (fc1 / ReLU / fc2) + residual
        hid = jnp.dot(y1.astype(jnp.bfloat16), w1[...],
                      preferred_element_type=jnp.float32) + b1[...]
        hid = jnp.maximum(hid, 0.0)
        f = jnp.dot(hid.astype(jnp.bfloat16), w2[...],
                    preferred_element_type=jnp.float32) + b2[...]
        z = f + y1

        # ---- LayerNorm2
        mu2 = jnp.mean(z, axis=-1, keepdims=True)
        var2 = jnp.mean(jnp.square(z - mu2), axis=-1, keepdims=True)
        out = (z - mu2) * jax.lax.rsqrt(var2 + eps) * g2[...] + be2[...]
        o_ref[...] = out.reshape(WB, N, C)

    def const(shape):
        return pl.BlockSpec(shape, lambda i: (0,) * len(shape))

    # NOTE: constant-index weight specs keep the same block index every step,
    # so they are fetched from HBM once and stay resident across the grid.
    return pl.pallas_call(
        kernel,
        out_shape=jax.ShapeDtypeStruct((Bw, N, C), jnp.float32),
        grid=(n_groups,),
        in_specs=[
            pl.BlockSpec((WB, N, C), lambda i: (i, 0, 0)),      # x window groups
            const((C, C)), const((C, C)), const((C, C)), const((C, C)),  # Wq..Wo
            const((1, C)), const((1, C)), const((1, C)), const((1, C)),  # bq..bo
            const((num_heads, N, N)),                           # rel-pos bias
            const((1, C)), const((1, C)),                       # LN1 gamma/beta
            const((C, F)), const((1, F)),                       # fc1
            const((F, C)), const((1, C)),                       # fc2
            const((1, C)), const((1, C)),                       # LN2 gamma/beta
        ],
        out_specs=pl.BlockSpec((WB, N, C), lambda i: (i, 0, 0)),
        compiler_params=pltpu.CompilerParams(
            dimension_semantics=("parallel",),
            vmem_limit_bytes=_VMEM_LIMIT_BYTES),
    )(x_windows, p["wq"], p["wk"], p["wv"], p["wo"],
      p["bq"], p["bk"], p["bv"], p["bo"], p["bias"],
      p["ln1_g"], p["ln1_b"], p["w1"], p["b1"],
      p["w2"], p["b2"], p["ln2_g"], p["ln2_b"])


# ----------------------------------------------------------------------------
# One-time parameter prep (hoisted out of the per-call path)
# ----------------------------------------------------------------------------
def prepare_params(params, *, window_size, num_heads):
    """Fold attention scale into Wq/bq, pre-cast MXU weights to bf16, and
    precompute the relative-position bias once."""
    C = params["wq"].shape[0]
    scale = float(C // num_heads) ** (-0.5)
    return dict(
        wq=(params["wq"] * scale).astype(jnp.bfloat16),
        bq=params["bq"] * scale,
        wk=params["wk"].astype(jnp.bfloat16), bk=params["bk"],
        wv=params["wv"].astype(jnp.bfloat16), bv=params["bv"],
        wo=params["wo"].astype(jnp.bfloat16), bo=params["bo"],
        bias=relative_position_bias(params["rpb_table"], window_size, num_heads),
        ln1_g=params["ln1_g"], ln1_b=params["ln1_b"],
        w1=params["w1"].astype(jnp.bfloat16), b1=params["b1"],
        w2=params["w2"].astype(jnp.bfloat16), b2=params["b2"],
        ln2_g=params["ln2_g"], ln2_b=params["ln2_b"],
    )


# ----------------------------------------------------------------------------
# EncoderLayer forward (use_gx=False, shift_size=0; dropout = identity)
# ----------------------------------------------------------------------------
# TODO(synk): use_gx=True and shift_size>0 branches (gx token fan-out/mean,
# shifted-window roll + attn mask) are not taken under the default config and
# are not implemented here.
# TODO(synk): when H//ws > 1 the window partition/reverse transposes could be
# folded into the kernel's BlockSpec index_map over a (B, H//ws, ws, W//ws,
# ws, C) view to save two small HBM passes; with the default PureT config
# (window_size == input_resolution) they are pure reshapes already.
def encoder_layer_forward(x, prep, *, input_resolution, window_size, num_heads):
    H, W = input_resolution
    B, L, C = x.shape
    assert L == H * W, "input feature has wrong size"

    xw = window_partition(x.reshape(B, H, W, C), window_size)
    xw = xw.reshape(-1, window_size * window_size, C)

    # MHSA + residual + LN1 + FFN + residual + LN2, all fused per window group.
    # Legal because LN/FFN are row-wise, so they commute with window_reverse.
    yw = fused_encoder_layer(xw, prep, num_heads=num_heads)

    y = window_reverse(yw.reshape(-1, window_size, window_size, C),
                       window_size, H, W)
    return y.reshape(B, L, C)


# ----------------------------------------------------------------------------
# Pure-JAX reference (f32, no Pallas) for correctness check
# ----------------------------------------------------------------------------
def ref_forward(x, params, *, input_resolution, window_size, num_heads):
    H, W = input_resolution
    B, L, C = x.shape
    hd = C // num_heads
    scale = float(hd) ** (-0.5)
    sc = x

    xs = x.reshape(B, H, W, C)
    xw = window_partition(xs, window_size).reshape(-1, window_size * window_size, C)
    Bw, N, _ = xw.shape

    def proj(w, b):
        return (xw @ w + b).reshape(Bw, N, num_heads, hd).transpose(0, 2, 1, 3)

    q = proj(params["wq"], params["bq"])
    k = proj(params["wk"], params["bk"])
    v = proj(params["wv"], params["bv"])
    attn = jnp.einsum("bhnd,bhmd->bhnm", q, k) * scale
    attn = attn + relative_position_bias(params["rpb_table"], window_size, num_heads)[None]
    attn = jax.nn.softmax(attn, axis=-1)
    ctx = jnp.einsum("bhnm,bhmd->bhnd", attn, v).transpose(0, 2, 1, 3).reshape(Bw, N, C)
    ow = ctx @ params["wo"] + params["bo"]

    x_attn = window_reverse(ow.reshape(-1, window_size, window_size, C),
                            window_size, H, W).reshape(B, H * W, C)

    def ln(y, g, b):
        mu = y.mean(-1, keepdims=True)
        var = ((y - mu) ** 2).mean(-1, keepdims=True)
        return (y - mu) * jax.lax.rsqrt(var + 1e-5) * g + b

    y1 = ln(x_attn + sc, params["ln1_g"], params["ln1_b"])
    h = jnp.maximum(y1 @ params["w1"] + params["b1"], 0.0)
    f = h @ params["w2"] + params["b2"]
    return ln(f + y1, params["ln2_g"], params["ln2_b"])


# ----------------------------------------------------------------------------
# Deterministic parameter init (synthetic; linear weights stored as (in, out))
# ----------------------------------------------------------------------------
def init_params(key, C, num_heads, window_size, mlp_ratio):
    F = int(C * mlp_ratio)
    ks = jax.random.split(key, 16)
    n = lambda k, s: (0.02 * jax.random.normal(k, s, jnp.float32))
    return dict(
        wq=n(ks[0], (C, C)), bq=n(ks[1], (1, C)),
        wk=n(ks[2], (C, C)), bk=n(ks[3], (1, C)),
        wv=n(ks[4], (C, C)), bv=n(ks[5], (1, C)),
        wo=n(ks[6], (C, C)), bo=n(ks[7], (1, C)),
        rpb_table=n(ks[8], ((2 * window_size - 1) ** 2, num_heads)),
        ln1_g=1.0 + n(ks[9], (1, C)), ln1_b=n(ks[10], (1, C)),
        w1=n(ks[11], (C, F)), b1=n(ks[12], (1, F)),
        w2=n(ks[13], (F, C)), b2=n(ks[14], (1, C)),
        ln2_g=1.0 + n(ks[15], (1, C)), ln2_b=jnp.zeros((1, C), jnp.float32),
    )


if __name__ == "__main__":
    key = jax.random.PRNGKey(0)
    B, H, W, C = 2, 8, 8, 32
    num_heads, window_size, mlp_ratio = 4, 4, 4

    kx, kp = jax.random.split(key)
    x = jax.random.normal(kx, (B, H * W, C), jnp.float32)
    params = init_params(kp, C, num_heads, window_size, mlp_ratio)
    prep = prepare_params(params, window_size=window_size, num_heads=num_heads)

    fwd = jax.jit(functools.partial(encoder_layer_forward,
                                    input_resolution=(H, W),
                                    window_size=window_size,
                                    num_heads=num_heads))
    out = jax.block_until_ready(fwd(x, prep))

    ref = ref_forward(x, params, input_resolution=(H, W),
                      window_size=window_size, num_heads=num_heads)
    assert out.shape == (B, H * W, C)
    # bf16 MXU operands (f32 accumulate, f32 LN/softmax) -> slightly looser
    # tolerance than a pure-f32 pipeline.
    if not bool(jnp.allclose(out, ref, atol=5e-3, rtol=5e-3)):
        raise AssertionError(
            f"mismatch: max abs err = {float(jnp.max(jnp.abs(out - ref)))}")
    print("KERNEL_OK")
</pallas_src>

<mosaic_0001>
module attributes {stable_mosaic.version = 11 : i64} {
  func.func @kernel(%arg0: i32, %arg1: memref<4x16x32xf32, #tpu.memory_space<vmem>>, %arg2: memref<32x32xbf16, #tpu.memory_space<vmem>>, %arg3: memref<32x32xbf16, #tpu.memory_space<vmem>>, %arg4: memref<32x32xbf16, #tpu.memory_space<vmem>>, %arg5: memref<32x32xbf16, #tpu.memory_space<vmem>>, %arg6: memref<1x32xf32, #tpu.memory_space<vmem>>, %arg7: memref<1x32xf32, #tpu.memory_space<vmem>>, %arg8: memref<1x32xf32, #tpu.memory_space<vmem>>, %arg9: memref<1x32xf32, #tpu.memory_space<vmem>>, %arg10: memref<4x16x16xf32, #tpu.memory_space<vmem>>, %arg11: memref<1x32xf32, #tpu.memory_space<vmem>>, %arg12: memref<1x32xf32, #tpu.memory_space<vmem>>, %arg13: memref<32x128xbf16, #tpu.memory_space<vmem>>, %arg14: memref<1x128xf32, #tpu.memory_space<vmem>>, %arg15: memref<128x32xbf16, #tpu.memory_space<vmem>>, %arg16: memref<1x32xf32, #tpu.memory_space<vmem>>, %arg17: memref<1x32xf32, #tpu.memory_space<vmem>>, %arg18: memref<1x32xf32, #tpu.memory_space<vmem>>, %arg19: memref<4x16x32xf32, #tpu.memory_space<vmem>>) attributes {dimension_semantics = [#tpu.dimension_semantics<parallel>], iteration_bounds = array<i64: 2>, scalar_prefetch = 0 : i64, scratch_operands = 0 : i64, tpu.core_type = #tpu.core_type<tc>, window_params = [{transform_indices = @transform_0, window_bounds = array<i64: 4, 16, 32>}, {pipeline_mode = #tpu.pipeline_mode<synchronous>, transform_indices = @transform_1, window_bounds = array<i64: 32, 32>}, {pipeline_mode = #tpu.pipeline_mode<synchronous>, transform_indices = @transform_2, window_bounds = array<i64: 32, 32>}, {pipeline_mode = #tpu.pipeline_mode<synchronous>, transform_indices = @transform_3, window_bounds = array<i64: 32, 32>}, {pipeline_mode = #tpu.pipeline_mode<synchronous>, transform_indices = @transform_4, window_bounds = array<i64: 32, 32>}, {pipeline_mode = #tpu.pipeline_mode<synchronous>, transform_indices = @transform_5, window_bounds = array<i64: 1, 32>}, {pipeline_mode = #tpu.pipeline_mode<synchronous>, transform_indices = @transform_6, window_bounds = array<i64: 1, 32>}, {pipeline_mode = #tpu.pipeline_mode<synchronous>, transform_indices = @transform_7, window_bounds = array<i64: 1, 32>}, {pipeline_mode = #tpu.pipeline_mode<synchronous>, transform_indices = @transform_8, window_bounds = array<i64: 1, 32>}, {pipeline_mode = #tpu.pipeline_mode<synchronous>, transform_indices = @transform_9, window_bounds = array<i64: 4, 16, 16>}, {pipeline_mode = #tpu.pipeline_mode<synchronous>, transform_indices = @transform_10, window_bounds = array<i64: 1, 32>}, {pipeline_mode = #tpu.pipeline_mode<synchronous>, transform_indices = @transform_11, window_bounds = array<i64: 1, 32>}, {pipeline_mode = #tpu.pipeline_mode<synchronous>, transform_indices = @transform_12, window_bounds = array<i64: 32, 128>}, {pipeline_mode = #tpu.pipeline_mode<synchronous>, transform_indices = @transform_13, window_bounds = array<i64: 1, 128>}, {pipeline_mode = #tpu.pipeline_mode<synchronous>, transform_indices = @transform_14, window_bounds = array<i64: 128, 32>}, {pipeline_mode = #tpu.pipeline_mode<synchronous>, transform_indices = @transform_15, window_bounds = array<i64: 1, 32>}, {pipeline_mode = #tpu.pipeline_mode<synchronous>, transform_indices = @transform_16, window_bounds = array<i64: 1, 32>}, {pipeline_mode = #tpu.pipeline_mode<synchronous>, transform_indices = @transform_17, window_bounds = array<i64: 1, 32>}, {transform_indices = @transform_18, window_bounds = array<i64: 4, 16, 32>}]} {
    %c0 = arith.constant 0 : index
    %c0_0 = arith.constant 0 : index
    %c0_1 = arith.constant 0 : index
    %0 = vector.load %arg1[%c0, %c0_0, %c0_1] : memref<4x16x32xf32, #tpu.memory_space<vmem>>, vector<4x16x32xf32>
    %1 = vector.shape_cast %0 : vector<4x16x32xf32> to vector<64x32xf32>
    %2 = arith.truncf %1 : vector<64x32xf32> to vector<64x32xbf16>
    %c0_2 = arith.constant 0 : index
    %c0_3 = arith.constant 0 : index
    %3 = vector.load %arg2[%c0_2, %c0_3] : memref<32x32xbf16, #tpu.memory_space<vmem>>, vector<32x32xbf16>
    %cst = arith.constant dense<0.000000e+00> : vector<64x32xf32>
    %4 = tpu.matmul %2, %3, %cst {dimension_numbers = #tpu.dot_dimension_numbers<[1], [0], [0], [1], [0, 0, 1, 1], [], []>} : vector<64x32xbf16>, vector<32x32xbf16>, vector<64x32xf32> -> vector<64x32xf32>
    %c0_4 = arith.constant 0 : index
    %c0_5 = arith.constant 0 : index
    %5 = vector.load %arg6[%c0_4, %c0_5] : memref<1x32xf32, #tpu.memory_space<vmem>>, vector<1x32xf32>
    %6 = vector.broadcast %5 : vector<1x32xf32> to vector<64x32xf32>
    %7 = arith.addf %4, %6 : vector<64x32xf32>
    %c0_6 = arith.constant 0 : index
    %c0_7 = arith.constant 0 : index
    %8 = vector.load %arg3[%c0_6, %c0_7] : memref<32x32xbf16, #tpu.memory_space<vmem>>, vector<32x32xbf16>
    %cst_8 = arith.constant dense<0.000000e+00> : vector<64x32xf32>
    %9 = tpu.matmul %2, %8, %cst_8 {dimension_numbers = #tpu.dot_dimension_numbers<[1], [0], [0], [1], [0, 0, 1, 1], [], []>} : vector<64x32xbf16>, vector<32x32xbf16>, vector<64x32xf32> -> vector<64x32xf32>
    %c0_9 = arith.constant 0 : index
    %c0_10 = arith.constant 0 : index
    %10 = vector.load %arg7[%c0_9, %c0_10] : memref<1x32xf32, #tpu.memory_space<vmem>>, vector<1x32xf32>
    %11 = vector.broadcast %10 : vector<1x32xf32> to vector<64x32xf32>
    %12 = arith.addf %9, %11 : vector<64x32xf32>
    %c0_11 = arith.constant 0 : index
    %c0_12 = arith.constant 0 : index
    %13 = vector.load %arg4[%c0_11, %c0_12] : memref<32x32xbf16, #tpu.memory_space<vmem>>, vector<32x32xbf16>
    %cst_13 = arith.constant dense<0.000000e+00> : vector<64x32xf32>
    %14 = tpu.matmul %2, %13, %cst_13 {dimension_numbers = #tpu.dot_dimension_numbers<[1], [0], [0], [1], [0, 0, 1, 1], [], []>} : vector<64x32xbf16>, vector<32x32xbf16>, vector<64x32xf32> -> vector<64x32xf32>
    %c0_14 = arith.constant 0 : index
    %c0_15 = arith.constant 0 : index
    %15 = vector.load %arg8[%c0_14, %c0_15] : memref<1x32xf32, #tpu.memory_space<vmem>>, vector<1x32xf32>
    %16 = vector.broadcast %15 : vector<1x32xf32> to vector<64x32xf32>
    %17 = arith.addf %14, %16 : vector<64x32xf32>
    %18 = vector.shape_cast %7 : vector<64x32xf32> to vector<4x16x32xf32>
    %19 = arith.truncf %18 : vector<4x16x32xf32> to vector<4x16x32xbf16>
    %20 = vector.shape_cast %12 : vector<64x32xf32> to vector<4x16x32xf32>
    %21 = arith.truncf %20 : vector<4x16x32xf32> to vector<4x16x32xbf16>
    %22 = vector.shape_cast %17 : vector<64x32xf32> to vector<4x16x32xf32>
    %23 = arith.truncf %22 : vector<4x16x32xf32> to vector<4x16x32xbf16>
    %24 = vector.extract_strided_slice %19 {offsets = [0, 0, 0], sizes = [4, 16, 8], strides = [1, 1, 1]} : vector<4x16x32xbf16> to vector<4x16x8xbf16>
    %25 = vector.extract_strided_slice %21 {offsets = [0, 0, 0], sizes = [4, 16, 8], strides = [1, 1, 1]} : vector<4x16x32xbf16> to vector<4x16x8xbf16>
    %26 = vector.extract_strided_slice %23 {offsets = [0, 0, 0], sizes = [4, 16, 8], strides = [1, 1, 1]} : vector<4x16x32xbf16> to vector<4x16x8xbf16>
    "tpu.trace_start"() <{level = 10 : i32, message = "wnd,wmd->wnm"}> : () -> ()
    %cst_16 = arith.constant dense<0.000000e+00> : vector<4x16x16xf32>
    %27 = tpu.matmul %24, %25, %cst_16 {dimension_numbers = #tpu.dot_dimension_numbers<[2], [2], [1], [1], [0, 0, 0, 1, 1, 1], [0], [0]>} : vector<4x16x8xbf16>, vector<4x16x8xbf16>, vector<4x16x16xf32> -> vector<4x16x16xf32>
    "tpu.trace_stop"() : () -> ()
    %c0_17 = arith.constant 0 : index
    %c0_18 = arith.constant 0 : index
    %c0_19 = arith.constant 0 : index
    %28 = vector.load %arg10[%c0_17, %c0_18, %c0_19] : memref<4x16x16xf32, #tpu.memory_space<vmem>>, vector<1x16x16xf32>
    %29 = vector.shape_cast %28 : vector<1x16x16xf32> to vector<16x16xf32>
    %30 = vector.shape_cast %29 : vector<16x16xf32> to vector<1x16x16xf32>
    %31 = vector.broadcast %30 : vector<1x16x16xf32> to vector<4x16x16xf32>
    %32 = arith.addf %27, %31 : vector<4x16x16xf32>
    %cst_20 = arith.constant dense<0xFF800000> : vector<4x16xf32>
    %33 = vector.multi_reduction <maximumf>, %32, %cst_20 [2] : vector<4x16x16xf32> to vector<4x16xf32>
    %34 = vector.shape_cast %33 : vector<4x16xf32> to vector<4x16x1xf32>
    %35 = vector.broadcast %34 : vector<4x16x1xf32> to vector<4x16x16xf32>
    %36 = arith.subf %32, %35 : vector<4x16x16xf32>
    %37 = math.exp %36 : vector<4x16x16xf32>
    %cst_21 = arith.constant dense<0.000000e+00> : vector<4x16xf32>
    %38 = vector.multi_reduction <add>, %37, %cst_21 [2] : vector<4x16x16xf32> to vector<4x16xf32>
    %39 = vector.shape_cast %38 : vector<4x16xf32> to vector<4x16x1xf32>
    %40 = tpu.reciprocal %39 {approx = true} : vector<4x16x1xf32> -> vector<4x16x1xf32>
    %41 = vector.broadcast %40 : vector<4x16x1xf32> to vector<4x16x16xf32>
    %42 = arith.mulf %37, %41 : vector<4x16x16xf32>
    %43 = arith.truncf %42 : vector<4x16x16xf32> to vector<4x16x16xbf16>
    "tpu.trace_start"() <{level = 10 : i32, message = "wnm,wmd->wnd"}> : () -> ()
    %cst_22 = arith.constant dense<0.000000e+00> : vector<4x16x8xf32>
    %44 = tpu.matmul %43, %26, %cst_22 {dimension_numbers = #tpu.dot_dimension_numbers<[2], [1], [1], [2], [0, 0, 0, 1, 1, 2], [0], [0]>} : vector<4x16x16xbf16>, vector<4x16x8xbf16>, vector<4x16x8xf32> -> vector<4x16x8xf32>
    "tpu.trace_stop"() : () -> ()
    %45 = vector.extract_strided_slice %19 {offsets = [0, 0, 8], sizes = [4, 16, 8], strides = [1, 1, 1]} : vector<4x16x32xbf16> to vector<4x16x8xbf16>
    %46 = vector.extract_strided_slice %21 {offsets = [0, 0, 8], sizes = [4, 16, 8], strides = [1, 1, 1]} : vector<4x16x32xbf16> to vector<4x16x8xbf16>
    %47 = vector.extract_strided_slice %23 {offsets = [0, 0, 8], sizes = [4, 16, 8], strides = [1, 1, 1]} : vector<4x16x32xbf16> to vector<4x16x8xbf16>
    "tpu.trace_start"() <{level = 10 : i32, message = "wnd,wmd->wnm"}> : () -> ()
    %cst_23 = arith.constant dense<0.000000e+00> : vector<4x16x16xf32>
    %48 = tpu.matmul %45, %46, %cst_23 {dimension_numbers = #tpu.dot_dimension_numbers<[2], [2], [1], [1], [0, 0, 0, 1, 1, 1], [0], [0]>} : vector<4x16x8xbf16>, vector<4x16x8xbf16>, vector<4x16x16xf32> -> vector<4x16x16xf32>
    "tpu.trace_stop"() : () -> ()
    %c1 = arith.constant 1 : index
    %c0_24 = arith.constant 0 : index
    %c0_25 = arith.constant 0 : index
    %49 = vector.load %arg10[%c1, %c0_24, %c0_25] : memref<4x16x16xf32, #tpu.memory_space<vmem>>, vector<1x16x16xf32>
    %50 = vector.shape_cast %49 : vector<1x16x16xf32> to vector<16x16xf32>
    %51 = vector.shape_cast %50 : vector<16x16xf32> to vector<1x16x16xf32>
    %52 = vector.broadcast %51 : vector<1x16x16xf32> to vector<4x16x16xf32>
    %53 = arith.addf %48, %52 : vector<4x16x16xf32>
    %cst_26 = arith.constant dense<0xFF800000> : vector<4x16xf32>
    %54 = vector.multi_reduction <maximumf>, %53, %cst_26 [2] : vector<4x16x16xf32> to vector<4x16xf32>
    %55 = vector.shape_cast %54 : vector<4x16xf32> to vector<4x16x1xf32>
    %56 = vector.broadcast %55 : vector<4x16x1xf32> to vector<4x16x16xf32>
    %57 = arith.subf %53, %56 : vector<4x16x16xf32>
    %58 = math.exp %57 : vector<4x16x16xf32>
    %cst_27 = arith.constant dense<0.000000e+00> : vector<4x16xf32>
    %59 = vector.multi_reduction <add>, %58, %cst_27 [2] : vector<4x16x16xf32> to vector<4x16xf32>
    %60 = vector.shape_cast %59 : vector<4x16xf32> to vector<4x16x1xf32>
    %61 = tpu.reciprocal %60 {approx = true} : vector<4x16x1xf32> -> vector<4x16x1xf32>
    %62 = vector.broadcast %61 : vector<4x16x1xf32> to vector<4x16x16xf32>
    %63 = arith.mulf %58, %62 : vector<4x16x16xf32>
    %64 = arith.truncf %63 : vector<4x16x16xf32> to vector<4x16x16xbf16>
    "tpu.trace_start"() <{level = 10 : i32, message = "wnm,wmd->wnd"}> : () -> ()
    %cst_28 = arith.constant dense<0.000000e+00> : vector<4x16x8xf32>
    %65 = tpu.matmul %64, %47, %cst_28 {dimension_numbers = #tpu.dot_dimension_numbers<[2], [1], [1], [2], [0, 0, 0, 1, 1, 2], [0], [0]>} : vector<4x16x16xbf16>, vector<4x16x8xbf16>, vector<4x16x8xf32> -> vector<4x16x8xf32>
    "tpu.trace_stop"() : () -> ()
    %66 = vector.extract_strided_slice %19 {offsets = [0, 0, 16], sizes = [4, 16, 8], strides = [1, 1, 1]} : vector<4x16x32xbf16> to vector<4x16x8xbf16>
    %67 = vector.extract_strided_slice %21 {offsets = [0, 0, 16], sizes = [4, 16, 8], strides = [1, 1, 1]} : vector<4x16x32xbf16> to vector<4x16x8xbf16>
    %68 = vector.extract_strided_slice %23 {offsets = [0, 0, 16], sizes = [4, 16, 8], strides = [1, 1, 1]} : vector<4x16x32xbf16> to vector<4x16x8xbf16>
    "tpu.trace_start"() <{level = 10 : i32, message = "wnd,wmd->wnm"}> : () -> ()
    %cst_29 = arith.constant dense<0.000000e+00> : vector<4x16x16xf32>
    %69 = tpu.matmul %66, %67, %cst_29 {dimension_numbers = #tpu.dot_dimension_numbers<[2], [2], [1], [1], [0, 0, 0, 1, 1, 1], [0], [0]>} : vector<4x16x8xbf16>, vector<4x16x8xbf16>, vector<4x16x16xf32> -> vector<4x16x16xf32>
    "tpu.trace_stop"() : () -> ()
    %c2 = arith.constant 2 : index
    %c0_30 = arith.constant 0 : index
    %c0_31 = arith.constant 0 : index
    %70 = vector.load %arg10[%c2, %c0_30, %c0_31] : memref<4x16x16xf32, #tpu.memory_space<vmem>>, vector<1x16x16xf32>
    %71 = vector.shape_cast %70 : vector<1x16x16xf32> to vector<16x16xf32>
    %72 = vector.shape_cast %71 : vector<16x16xf32> to vector<1x16x16xf32>
    %73 = vector.broadcast %72 : vector<1x16x16xf32> to vector<4x16x16xf32>
    %74 = arith.addf %69, %73 : vector<4x16x16xf32>
    %cst_32 = arith.constant dense<0xFF800000> : vector<4x16xf32>
    %75 = vector.multi_reduction <maximumf>, %74, %cst_32 [2] : vector<4x16x16xf32> to vector<4x16xf32>
    %76 = vector.shape_cast %75 : vector<4x16xf32> to vector<4x16x1xf32>
    %77 = vector.broadcast %76 : vector<4x16x1xf32> to vector<4x16x16xf32>
    %78 = arith.subf %74, %77 : vector<4x16x16xf32>
    %79 = math.exp %78 : vector<4x16x16xf32>
    %cst_33 = arith.constant dense<0.000000e+00> : vector<4x16xf32>
    %80 = vector.multi_reduction <add>, %79, %cst_33 [2] : vector<4x16x16xf32> to vector<4x16xf32>
    %81 = vector.shape_cast %80 : vector<4x16xf32> to vector<4x16x1xf32>
    %82 = tpu.reciprocal %81 {approx = true} : vector<4x16x1xf32> -> vector<4x16x1xf32>
    %83 = vector.broadcast %82 : vector<4x16x1xf32> to vector<4x16x16xf32>
    %84 = arith.mulf %79, %83 : vector<4x16x16xf32>
    %85 = arith.truncf %84 : vector<4x16x16xf32> to vector<4x16x16xbf16>
    "tpu.trace_start"() <{level = 10 : i32, message = "wnm,wmd->wnd"}> : () -> ()
    %cst_34 = arith.constant dense<0.000000e+00> : vector<4x16x8xf32>
    %86 = tpu.matmul %85, %68, %cst_34 {dimension_numbers = #tpu.dot_dimension_numbers<[2], [1], [1], [2], [0, 0, 0, 1, 1, 2], [0], [0]>} : vector<4x16x16xbf16>, vector<4x16x8xbf16>, vector<4x16x8xf32> -> vector<4x16x8xf32>
    "tpu.trace_stop"() : () -> ()
    %87 = vector.extract_strided_slice %19 {offsets = [0, 0, 24], sizes = [4, 16, 8], strides = [1, 1, 1]} : vector<4x16x32xbf16> to vector<4x16x8xbf16>
    %88 = vector.extract_strided_slice %21 {offsets = [0, 0, 24], sizes = [4, 16, 8], strides = [1, 1, 1]} : vector<4x16x32xbf16> to vector<4x16x8xbf16>
    %89 = vector.extract_strided_slice %23 {offsets = [0, 0, 24], sizes = [4, 16, 8], strides = [1, 1, 1]} : vector<4x16x32xbf16> to vector<4x16x8xbf16>
    "tpu.trace_start"() <{level = 10 : i32, message = "wnd,wmd->wnm"}> : () -> ()
    %cst_35 = arith.constant dense<0.000000e+00> : vector<4x16x16xf32>
    %90 = tpu.matmul %87, %88, %cst_35 {dimension_numbers = #tpu.dot_dimension_numbers<[2], [2], [1], [1], [0, 0, 0, 1, 1, 1], [0], [0]>} : vector<4x16x8xbf16>, vector<4x16x8xbf16>, vector<4x16x16xf32> -> vector<4x16x16xf32>
    "tpu.trace_stop"() : () -> ()
    %c3 = arith.constant 3 : index
    %c0_36 = arith.constant 0 : index
    %c0_37 = arith.constant 0 : index
    %91 = vector.load %arg10[%c3, %c0_36, %c0_37] : memref<4x16x16xf32, #tpu.memory_space<vmem>>, vector<1x16x16xf32>
    %92 = vector.shape_cast %91 : vector<1x16x16xf32> to vector<16x16xf32>
    %93 = vector.shape_cast %92 : vector<16x16xf32> to vector<1x16x16xf32>
    %94 = vector.broadcast %93 : vector<1x16x16xf32> to vector<4x16x16xf32>
    %95 = arith.addf %90, %94 : vector<4x16x16xf32>
    %cst_38 = arith.constant dense<0xFF800000> : vector<4x16xf32>
    %96 = vector.multi_reduction <maximumf>, %95, %cst_38 [2] : vector<4x16x16xf32> to vector<4x16xf32>
    %97 = vector.shape_cast %96 : vector<4x16xf32> to vector<4x16x1xf32>
    %98 = vector.broadcast %97 : vector<4x16x1xf32> to vector<4x16x16xf32>
    %99 = arith.subf %95, %98 : vector<4x16x16xf32>
    %100 = math.exp %99 : vector<4x16x16xf32>
    %cst_39 = arith.constant dense<0.000000e+00> : vector<4x16xf32>
    %101 = vector.multi_reduction <add>, %100, %cst_39 [2] : vector<4x16x16xf32> to vector<4x16xf32>
    %102 = vector.shape_cast %101 : vector<4x16xf32> to vector<4x16x1xf32>
    %103 = tpu.reciprocal %102 {approx = true} : vector<4x16x1xf32> -> vector<4x16x1xf32>
    %104 = vector.broadcast %103 : vector<4x16x1xf32> to vector<4x16x16xf32>
    %105 = arith.mulf %100, %104 : vector<4x16x16xf32>
    %106 = arith.truncf %105 : vector<4x16x16xf32> to vector<4x16x16xbf16>
    "tpu.trace_start"() <{level = 10 : i32, message = "wnm,wmd->wnd"}> : () -> ()
    %cst_40 = arith.constant dense<0.000000e+00> : vector<4x16x8xf32>
    %107 = tpu.matmul %106, %89, %cst_40 {dimension_numbers = #tpu.dot_dimension_numbers<[2], [1], [1], [2], [0, 0, 0, 1, 1, 2], [0], [0]>} : vector<4x16x16xbf16>, vector<4x16x8xbf16>, vector<4x16x8xf32> -> vector<4x16x8xf32>
    "tpu.trace_stop"() : () -> ()
    %108 = tpu.concatenate %44, %65, %86, %107 in 2 : vector<4x16x8xf32>, vector<4x16x8xf32>, vector<4x16x8xf32>, vector<4x16x8xf32> -> vector<4x16x32xf32>
    %109 = vector.shape_cast %108 : vector<4x16x32xf32> to vector<64x32xf32>
    %110 = arith.truncf %109 : vector<64x32xf32> to vector<64x32xbf16>
    %c0_41 = arith.constant 0 : index
    %c0_42 = arith.constant 0 : index
    %111 = vector.load %arg5[%c0_41, %c0_42] : memref<32x32xbf16, #tpu.memory_space<vmem>>, vector<32x32xbf16>
    %cst_43 = arith.constant dense<0.000000e+00> : vector<64x32xf32>
    %112 = tpu.matmul %110, %111, %cst_43 {dimension_numbers = #tpu.dot_dimension_numbers<[1], [0], [0], [1], [0, 0, 1, 1], [], []>} : vector<64x32xbf16>, vector<32x32xbf16>, vector<64x32xf32> -> vector<64x32xf32>
    %c0_44 = arith.constant 0 : index
    %c0_45 = arith.constant 0 : index
    %113 = vector.load %arg9[%c0_44, %c0_45] : memref<1x32xf32, #tpu.memory_space<vmem>>, vector<1x32xf32>
    %114 = vector.broadcast %113 : vector<1x32xf32> to vector<64x32xf32>
    %115 = arith.addf %112, %114 : vector<64x32xf32>
    %116 = arith.addf %115, %1 : vector<64x32xf32>
    %cst_46 = arith.constant dense<0.000000e+00> : vector<64xf32>
    %117 = vector.multi_reduction <add>, %116, %cst_46 [1] : vector<64x32xf32> to vector<64xf32>
    %118 = vector.shape_cast %117 : vector<64xf32> to vector<64x1xf32>
    %cst_47 = arith.constant 3.200000e+01 : f32
    %119 = vector.broadcast %cst_47 : f32 to vector<64x1xf32>
    %120 = arith.divf %118, %119 : vector<64x1xf32>
    %121 = vector.broadcast %120 : vector<64x1xf32> to vector<64x32xf32>
    %122 = arith.subf %116, %121 : vector<64x32xf32>
    %123 = arith.mulf %122, %122 : vector<64x32xf32>
    %cst_48 = arith.constant dense<0.000000e+00> : vector<64xf32>
    %124 = vector.multi_reduction <add>, %123, %cst_48 [1] : vector<64x32xf32> to vector<64xf32>
    %125 = vector.shape_cast %124 : vector<64xf32> to vector<64x1xf32>
    %cst_49 = arith.constant 3.200000e+01 : f32
    %126 = vector.broadcast %cst_49 : f32 to vector<64x1xf32>
    %127 = arith.divf %125, %126 : vector<64x1xf32>
    %128 = vector.broadcast %120 : vector<64x1xf32> to vector<64x32xf32>
    %129 = arith.subf %116, %128 : vector<64x32xf32>
    %cst_50 = arith.constant 9.99999974E-6 : f32
    %130 = vector.broadcast %cst_50 : f32 to vector<64x1xf32>
    %131 = arith.addf %127, %130 : vector<64x1xf32>
    %132 = math.rsqrt %131 : vector<64x1xf32>
    %133 = vector.broadcast %132 : vector<64x1xf32> to vector<64x32xf32>
    %134 = arith.mulf %129, %133 : vector<64x32xf32>
    %c0_51 = arith.constant 0 : index
    %c0_52 = arith.constant 0 : index
    %135 = vector.load %arg11[%c0_51, %c0_52] : memref<1x32xf32, #tpu.memory_space<vmem>>, vector<1x32xf32>
    %136 = vector.broadcast %135 : vector<1x32xf32> to vector<64x32xf32>
    %137 = arith.mulf %134, %136 : vector<64x32xf32>
    %c0_53 = arith.constant 0 : index
    %c0_54 = arith.constant 0 : index
    %138 = vector.load %arg12[%c0_53, %c0_54] : memref<1x32xf32, #tpu.memory_space<vmem>>, vector<1x32xf32>
    %139 = vector.broadcast %138 : vector<1x32xf32> to vector<64x32xf32>
    %140 = arith.addf %137, %139 : vector<64x32xf32>
    %141 = arith.truncf %140 : vector<64x32xf32> to vector<64x32xbf16>
    %c0_55 = arith.constant 0 : index
    %c0_56 = arith.constant 0 : index
    %142 = vector.load %arg13[%c0_55, %c0_56] : memref<32x128xbf16, #tpu.memory_space<vmem>>, vector<32x128xbf16>
    %cst_57 = arith.constant dense<0.000000e+00> : vector<64x128xf32>
    %143 = tpu.matmul %141, %142, %cst_57 {dimension_numbers = #tpu.dot_dimension_numbers<[1], [0], [0], [1], [0, 0, 1, 1], [], []>} : vector<64x32xbf16>, vector<32x128xbf16>, vector<64x128xf32> -> vector<64x128xf32>
    %c0_58 = arith.constant 0 : index
    %c0_59 = arith.constant 0 : index
    %144 = vector.load %arg14[%c0_58, %c0_59] : memref<1x128xf32, #tpu.memory_space<vmem>>, vector<1x128xf32>
    %145 = vector.broadcast %144 : vector<1x128xf32> to vector<64x128xf32>
    %146 = arith.addf %143, %145 : vector<64x128xf32>
    %cst_60 = arith.constant 0.000000e+00 : f32
    %147 = vector.broadcast %cst_60 : f32 to vector<64x128xf32>
    %148 = arith.maximumf %146, %147 : vector<64x128xf32>
    %149 = arith.truncf %148 : vector<64x128xf32> to vector<64x128xbf16>
    %c0_61 = arith.constant 0 : index
    %c0_62 = arith.constant 0 : index
    %150 = vector.load %arg15[%c0_61, %c0_62] : memref<128x32xbf16, #tpu.memory_space<vmem>>, vector<128x32xbf16>
    %cst_63 = arith.constant dense<0.000000e+00> : vector<64x32xf32>
    %151 = tpu.matmul %149, %150, %cst_63 {dimension_numbers = #tpu.dot_dimension_numbers<[1], [0], [0], [1], [0, 0, 1, 1], [], []>} : vector<64x128xbf16>, vector<128x32xbf16>, vector<64x32xf32> -> vector<64x32xf32>
    %c0_64 = arith.constant 0 : index
    %c0_65 = arith.constant 0 : index
    %152 = vector.load %arg16[%c0_64, %c0_65] : memref<1x32xf32, #tpu.memory_space<vmem>>, vector<1x32xf32>
    %153 = vector.broadcast %152 : vector<1x32xf32> to vector<64x32xf32>
    %154 = arith.addf %151, %153 : vector<64x32xf32>
    %155 = arith.addf %154, %140 : vector<64x32xf32>
    %cst_66 = arith.constant dense<0.000000e+00> : vector<64xf32>
    %156 = vector.multi_reduction <add>, %155, %cst_66 [1] : vector<64x32xf32> to vector<64xf32>
    %157 = vector.shape_cast %156 : vector<64xf32> to vector<64x1xf32>
    %cst_67 = arith.constant 3.200000e+01 : f32
    %158 = vector.broadcast %cst_67 : f32 to vector<64x1xf32>
    %159 = arith.divf %157, %158 : vector<64x1xf32>
    %160 = vector.broadcast %159 : vector<64x1xf32> to vector<64x32xf32>
    %161 = arith.subf %155, %160 : vector<64x32xf32>
    %162 = arith.mulf %161, %161 : vector<64x32xf32>
    %cst_68 = arith.constant dense<0.000000e+00> : vector<64xf32>
    %163 = vector.multi_reduction <add>, %162, %cst_68 [1] : vector<64x32xf32> to vector<64xf32>
    %164 = vector.shape_cast %163 : vector<64xf32> to vector<64x1xf32>
    %cst_69 = arith.constant 3.200000e+01 : f32
    %165 = vector.broadcast %cst_69 : f32 to vector<64x1xf32>
    %166 = arith.divf %164, %165 : vector<64x1xf32>
    %167 = vector.broadcast %159 : vector<64x1xf32> to vector<64x32xf32>
    %168 = arith.subf %155, %167 : vector<64x32xf32>
    %cst_70 = arith.constant 9.99999974E-6 : f32
    %169 = vector.broadcast %cst_70 : f32 to vector<64x1xf32>
    %170 = arith.addf %166, %169 : vector<64x1xf32>
    %171 = math.rsqrt %170 : vector<64x1xf32>
    %172 = vector.broadcast %171 : vector<64x1xf32> to vector<64x32xf32>
    %173 = arith.mulf %168, %172 : vector<64x32xf32>
    %c0_71 = arith.constant 0 : index
    %c0_72 = arith.constant 0 : index
    %174 = vector.load %arg17[%c0_71, %c0_72] : memref<1x32xf32, #tpu.memory_space<vmem>>, vector<1x32xf32>
    %175 = vector.broadcast %174 : vector<1x32xf32> to vector<64x32xf32>
    %176 = arith.mulf %173, %175 : vector<64x32xf32>
    %c0_73 = arith.constant 0 : index
    %c0_74 = arith.constant 0 : index
    %177 = vector.load %arg18[%c0_73, %c0_74] : memref<1x32xf32, #tpu.memory_space<vmem>>, vector<1x32xf32>
    %178 = vector.broadcast %177 : vector<1x32xf32> to vector<64x32xf32>
    %179 = arith.addf %176, %178 : vector<64x32xf32>
    %180 = vector.shape_cast %179 : vector<64x32xf32> to vector<4x16x32xf32>
    %c0_75 = arith.constant 0 : index
    %c0_76 = arith.constant 0 : index
    %c0_77 = arith.constant 0 : index
    %181 = vector.load %arg19[%c0_75, %c0_76, %c0_77] : memref<4x16x32xf32, #tpu.memory_space<vmem>>, vector<4x16x32xf32>
    tpu.vector_store %arg19[%c0_75, %c0_76, %c0_77], %180 {strides = array<i32>} : memref<4x16x32xf32, #tpu.memory_space<vmem>>, vector<4x16x32xf32>,
    return
  }
  func.func @transform_0(%arg0: i32) -> (i32, i32, i32) {
    %c0_i32 = arith.constant 0 : i32
    %c0_i32_0 = arith.constant 0 : i32
    %c0_i32_1 = arith.constant 0 : i32
    return %arg0, %c0_i32, %c0_i32_0 : i32, i32, i32
  }
  func.func @transform_1(%arg0: i32) -> (i32, i32) {
    %c0_i32 = arith.constant 0 : i32
    %c0_i32_0 = arith.constant 0 : i32
    %c0_i32_1 = arith.constant 0 : i32
    return %c0_i32, %c0_i32_0 : i32, i32
  }
  func.func @transform_2(%arg0: i32) -> (i32, i32) {
    %c0_i32 = arith.constant 0 : i32
    %c0_i32_0 = arith.constant 0 : i32
    %c0_i32_1 = arith.constant 0 : i32
    return %c0_i32, %c0_i32_0 : i32, i32
  }
  func.func @transform_3(%arg0: i32) -> (i32, i32) {
    %c0_i32 = arith.constant 0 : i32
    %c0_i32_0 = arith.constant 0 : i32
    %c0_i32_1 = arith.constant 0 : i32
    return %c0_i32, %c0_i32_0 : i32, i32
  }
  func.func @transform_4(%arg0: i32) -> (i32, i32) {
    %c0_i32 = arith.constant 0 : i32
    %c0_i32_0 = arith.constant 0 : i32
    %c0_i32_1 = arith.constant 0 : i32
    return %c0_i32, %c0_i32_0 : i32, i32
  }
  func.func @transform_5(%arg0: i32) -> (i32, i32) {
    %c0_i32 = arith.constant 0 : i32
    %c0_i32_0 = arith.constant 0 : i32
    %c0_i32_1 = arith.constant 0 : i32
    return %c0_i32, %c0_i32_0 : i32, i32
  }
  func.func @transform_6(%arg0: i32) -> (i32, i32) {
    %c0_i32 = arith.constant 0 : i32
    %c0_i32_0 = arith.constant 0 : i32
    %c0_i32_1 = arith.constant 0 : i32
    return %c0_i32, %c0_i32_0 : i32, i32
  }
  func.func @transform_7(%arg0: i32) -> (i32, i32) {
    %c0_i32 = arith.constant 0 : i32
    %c0_i32_0 = arith.constant 0 : i32
    %c0_i32_1 = arith.constant 0 : i32
    return %c0_i32, %c0_i32_0 : i32, i32
  }
  func.func @transform_8(%arg0: i32) -> (i32, i32) {
    %c0_i32 = arith.constant 0 : i32
    %c0_i32_0 = arith.constant 0 : i32
    %c0_i32_1 = arith.constant 0 : i32
    return %c0_i32, %c0_i32_0 : i32, i32
  }
  func.func @transform_9(%arg0: i32) -> (i32, i32, i32) {
    %c0_i32 = arith.constant 0 : i32
    %c0_i32_0 = arith.constant 0 : i32
    %c0_i32_1 = arith.constant 0 : i32
    %c0_i32_2 = arith.constant 0 : i32
    return %c0_i32, %c0_i32_0, %c0_i32_1 : i32, i32, i32
  }
  func.func @transform_10(%arg0: i32) -> (i32, i32) {
    %c0_i32 = arith.constant 0 : i32
    %c0_i32_0 = arith.constant 0 : i32
    %c0_i32_1 = arith.constant 0 : i32
    return %c0_i32, %c0_i32_0 : i32, i32
  }
  func.func @transform_11(%arg0: i32) -> (i32, i32) {
    %c0_i32 = arith.constant 0 : i32
    %c0_i32_0 = arith.constant 0 : i32
    %c0_i32_1 = arith.constant 0 : i32
    return %c0_i32, %c0_i32_0 : i32, i32
  }
  func.func @transform_12(%arg0: i32) -> (i32, i32) {
    %c0_i32 = arith.constant 0 : i32
    %c0_i32_0 = arith.constant 0 : i32
    %c0_i32_1 = arith.constant 0 : i32
    return %c0_i32, %c0_i32_0 : i32, i32
  }
  func.func @transform_13(%arg0: i32) -> (i32, i32) {
    %c0_i32 = arith.constant 0 : i32
    %c0_i32_0 = arith.constant 0 : i32
    %c0_i32_1 = arith.constant 0 : i32
    return %c0_i32, %c0_i32_0 : i32, i32
  }
  func.func @transform_14(%arg0: i32) -> (i32, i32) {
    %c0_i32 = arith.constant 0 : i32
    %c0_i32_0 = arith.constant 0 : i32
    %c0_i32_1 = arith.constant 0 : i32
    return %c0_i32, %c0_i32_0 : i32, i32
  }
  func.func @transform_15(%arg0: i32) -> (i32, i32) {
    %c0_i32 = arith.constant 0 : i32
    %c0_i32_0 = arith.constant 0 : i32
    %c0_i32_1 = arith.constant 0 : i32
    return %c0_i32, %c0_i32_0 : i32, i32
  }
  func.func @transform_16(%arg0: i32) -> (i32, i32) {
    %c0_i32 = arith.constant 0 : i32
    %c0_i32_0 = arith.constant 0 : i32
    %c0_i32_1 = arith.constant 0 : i32
    return %c0_i32, %c0_i32_0 : i32, i32
  }
  func.func @transform_17(%arg0: i32) -> (i32, i32) {
    %c0_i32 = arith.constant 0 : i32
    %c0_i32_0 = arith.constant 0 : i32
    %c0_i32_1 = arith.constant 0 : i32
    return %c0_i32, %c0_i32_0 : i32, i32
  }
  func.func @transform_18(%arg0: i32) -> (i32, i32, i32) {
    %c0_i32 = arith.constant 0 : i32
    %c0_i32_0 = arith.constant 0 : i32
    %c0_i32_1 = arith.constant 0 : i32
    return %arg0, %c0_i32, %c0_i32_0 : i32, i32, i32
  }
}

</mosaic_0001>

<bundles_post_ra>
// kernel: encoder_layer_forward.1
= control target key start
LH: loop header
LB: loop body
LE: loop exit
PB: predicated region body
PF: predicated region fallthrough
CT: control target
= control target key end

     0   :  { %s4503_s27 = smov 0   ;;  %s5341_s0 = inlined_call_operand.vmem [shape: f32[8,16,32], index: 0, kind: input, shape index: {}]   ;;  %s5342_s1 = inlined_call_operand.vmem [shape: bf16[32,32], index: 1, kind: input, shape index: {}]   ;;  %s5343_s2 = inlined_call_operand.vmem [shape: bf16[32,32], index: 2, kind: input, shape index: {}]   ;;  %s5344_s3 = inlined_call_operand.vmem [shape: bf16[32,32], index: 3, kind: input, shape index: {}]   ;;  %s5345_s4 = inlined_call_operand.vmem [shape: bf16[32,32], index: 4, kind: input, shape index: {}]   ;;  %s5346_s5 = inlined_call_operand.vmem [shape: f32[1,32], index: 5, kind: input, shape index: {}]   ;;  %s5347_s6 = inlined_call_operand.vmem [shape: f32[1,32], index: 6, kind: input, shape index: {}]   ;;  %s5348_s7 = inlined_call_operand.vmem [shape: f32[1,32], index: 7, kind: input, shape index: {}]   ;;  %s5349_s8 = inlined_call_operand.vmem [shape: f32[1,32], index: 8, kind: input, shape index: {}]   ;;  %s5350_s9 = inlined_call_operand.vmem [shape: f32[4,16,16], index: 9, kind: input, shape index: {}]   ;;  %s5351_s10 = inlined_call_operand.vmem [shape: f32[1,32], index: 10, kind: input, shape index: {}]   ;;  %s5352_s11 = inlined_call_operand.vmem [shape: f32[1,32], index: 11, kind: input, shape index: {}]   ;;  %s5353_s12 = inlined_call_operand.vmem [shape: bf16[32,128], index: 12, kind: input, shape index: {}]   ;;  %s5354_s13 = inlined_call_operand.vmem [shape: f32[1,128], index: 13, kind: input, shape index: {}]   ;;  %s5355_s14 = inlined_call_operand.vmem [shape: bf16[128,32], index: 14, kind: input, shape index: {}]   ;;  %s5356_s15 = inlined_call_operand.vmem [shape: f32[1,32], index: 15, kind: input, shape index: {}]   ;;  %s5357_s16 = inlined_call_operand.vmem [shape: f32[1,32], index: 16, kind: input, shape index: {}]   ;;  %s5358_s17 = inlined_call_operand.vmem [shape: f32[1,32], index: 17, kind: input, shape index: {}]   ;;  %s5359_s18 = inlined_call_operand.vmem [shape: f32[8,16,32], index: 18, kind: output, shape index: {}]  }
   0x1   :  { %5362 = sst [smem:[#allocation2_spill]] %s5341_s0 }
   0x2   :  { %5363 = sst [smem:[#allocation3_spill]] %s5342_s1 }
   0x3   :  { %5364 = sst [smem:[#allocation4_spill]] %s5343_s2 }
   0x4 LB: > { %s3647_s28 = sadd.s32 4294967295, %s4398_s27   ;;  %p3651_p0 = scmp.ge.s32.totalorder %s4398_s27, 1  ;;  %s4398_s27 = sphi %s4503_s27, %s28_s27  }
   0x5   : > { %p514_p1 = scmp.lt.s32.totalorder %s4398_s27, 3 }
   0x7   : > { %p515_p2 = pnand %p3651_p0, %p514_p1 }
   0x8   : > { %s5365_s0 = sld [smem:[#allocation3_spill]] (!%p515_p2)  ;;  %s3652_s19 = sshll.u32 (!%p515_p2), %s3647_s28, 2  ;;  %vm620_vm0 = vcmask (!%p515_p2), 261120   ;;  %v4210_v16 = vld [vmem:[%s5344_s3] sm:$0xff] (!%p515_p2)   ;;  %v4211_v17 = vld [vmem:[%s5344_s3 + $0x8] sm:$0xff] (!%p515_p2)   ;;  %v4400_v18 = vmov (!%p515_p2), 0.0  }
   0x9   : > { %518 = sbr.rel (%p515_p2) target bundleno = 4303 (0x10cf), region = 92  ;;  %p571_p3 = scmp.lt.s32.totalorder (!%p515_p2), %s3652_s19, 7  ;;  %3878 = vmatprep.subr.bf16.mxu0 (!%p515_p2), %v4210_v16  ;;  %vm4401_vm1 = vmmov (!%p515_p2), 0   ;;  %v3658_v20 = vld [vmem:[%s5346_s5] ss:$0 sm:$0xff] (!%p515_p2)  ;;  %vm888_vm2 = vcmask (!%p515_p2), 64512  }
   0xa   : > { %s5366_s2 = sld [smem:[#allocation4_spill]] (!%p515_p2)  ;;  %s5367_s26 = sld [smem:[#allocation2_spill]] (!%p515_p2)  ;;  %3879 = vmatpush3.bf16.msra.mxu0 (!%p515_p2), %v4210_v16  ;;  %v3665_v41 = vld [vmem:[%s5347_s6] ss:$0 sm:$0xff] (!%p515_p2)  ;;  %vm1077_vm3 = vcmask (!%p515_p2), 130048   ;;  %vm2931_vm4 = vcmask (!%p515_p2), 195584  }
   0xb   : > { %3880 = vmatprep.subr.bf16.mxu0 (!%p515_p2), %v4211_v17  ;;  %s4402_s25 = smov (!%p515_p2), 120   ;;  %s4403_s20 = smov (!%p515_p2), 112  }
   0xc   : > { %s4405_s21 = smov (!%p515_p2), 8   ;;  %s4406_s22 = smov (!%p515_p2), 16  }
   0xd   : > { %s4407_s30 = smov (!%p515_p2), 24  }
   0xe   : > { %v4206_v0 = vld [vmem:[%s5365_s0] sm:$0xff] (!%p515_p2)   ;;  %v4207_v1 = vld [vmem:[%s5365_s0 + $0x8] sm:$0xff] (!%p515_p2)   ;;  %3881 = vmatpush3.bf16.msra.mxu0 (!%p515_p2), %v4211_v17 }
   0xf   : > { %3854 = vmatprep.subr.bf16.mxu1 (!%p515_p2), %v4206_v0  ;;  %3902 = vmatprep.subr.bf16.mxu0 (!%p515_p2), %v4400_v18 }
  0x10   : > { %3855 = vmatpush3.bf16.msra.mxu1 %v4206_v0  ;;  %s5369_s19 = smov (!%p571_p3, %s3652_s19), 7  ;;  %v4208_v2 = vld [vmem:[%s5366_s2] sm:$0xff]   ;;  %v4209_v12 = vld [vmem:[%s5366_s2 + $0x8] sm:$0xff]  }
  0x11   : > { %3856 = vmatprep.subr.bf16.mxu1 %v4207_v1  ;;  %s3746_s23 = sshll.u32 %s5369_s19, 4 }
  0x12   : > { %s4528_s28 = scalar_lea.vmem %s5367_s26, %s3746_s23  ;;  %s4404_s26 = smov 104  }
  0x13   : > { %v585_v3 = vld [vmem:[%s4528_s28] sm:$0xff]  ;;  %v586_v4 = vld [vmem:[%s4528_s28 + $0x8] sm:$0xff]  ;;  %v587_v5 = vld [vmem:[%s4528_s28 + $0x10] sm:$0xff] }
  0x14   : > { %3857 = vmatpush3.bf16.msra.mxu1 %v4207_v1  ;;  %v593_v6 = vpack.c.bf16 %v586_v4, %v585_v3  ;;  %v588_v7 = vld [vmem:[%s4528_s28 + $0x18] sm:$0xff]  ;;  %v589_v8 = vld [vmem:[%s4528_s28 + $0x20] sm:$0xff]  ;;  %v590_v9 = vld [vmem:[%s4528_s28 + $0x28] sm:$0xff] }
  0x15   : > { %3866 = vmatprep.subr.bf16.mxu1 %v4208_v2  ;;  %v594_v10 = vpack.c.bf16 %v588_v7, %v587_v5  ;;  %v595_v11 = vpack.c.bf16 %v590_v9, %v589_v8  ;;  %v591_v13 = vld [vmem:[%s4528_s28 + $0x30] sm:$0xff]  ;;  %v592_v14 = vld [vmem:[%s4528_s28 + $0x38] sm:$0xff] }
  0x16   : > { %3858 = vmatprep.mubr.msk.bf16.mxu1 %vm620_vm0, %v593_v6  ;;  %3882 = vmatprep.mubr.msk.bf16.mxu0 %vm620_vm0, %v593_v6  ;;  %v596_v15 = vpack.c.bf16 %v592_v14, %v591_v13 }
  0x17   : > { %3859 = vmatmul.mubr.msk.bf16.vlgmr.msra.gmra.mrb[0].mxu1 %vm620_vm0, %v594_v10  ;;  %3883 = vmatmul.mubr.msk.bf16.vlgmr.msra.gmra.mrb[0].mxu0 %vm620_vm0, %v594_v10 }
  0x18   : > { %3862 = vmatprep.mubr.msk.bf16.mxu1 %vm620_vm0, %v595_v11  ;;  %3867 = vmatpush3.bf16.msra.mxu1 %v4208_v2  ;;  %v3672_v2 = vld [vmem:[%s5348_s7] ss:$0 sm:$0xff] }
  0x19   : > { %3868 = vmatprep.subr.bf16.mxu1 %v4209_v12  ;;  %3886 = vmatprep.mubr.msk.bf16.mxu0 %vm620_vm0, %v595_v11 }
  0x1c   : > { %3869 = vmatpush3.bf16.msra.mxu1 %v4209_v12 }
  0x1d   : > { %3890 = vmatprep.subr.bf16.mxu1 %v4400_v18 }
  0x1f   : > { %3863 = vmatmul.mubr.msk.bf16.gmra.mrb[4].mxu1 %vm620_vm0, %v596_v15  ;;  %3887 = vmatmul.mubr.msk.bf16.gmra.mrb[4].mxu0 %vm620_vm0, %v596_v15 }
  0x20   : > { %3870 = vmatprep.mubr.msk.bf16.mxu1 %vm620_vm0, %v593_v6  ;;  %3904 = vmatprep.mubr.msk.bf16.mxu0 %vm4401_vm1, %v4400_v18 }
  0x27   : > { %3871 = vmatmul.mubr.msk.bf16.vlgmr.msra.gmra.mrb[8].mxu1 %vm620_vm0, %v594_v10 }
  0x28   : > { %3874 = vmatprep.mubr.msk.bf16.mxu1 %vm620_vm0, %v595_v11 }
  0x2f   : > { %3875 = vmatmul.mubr.msk.bf16.gmra.mrb[12].mxu1 %vm620_vm0, %v596_v15 }
  0x30   : > { %3892 = vmatprep.mubr.msk.bf16.mxu1 %vm4401_vm1, %v4400_v18 }
  0xea   : > { %v3860_v19 = vpop.f32.mrb[0].mxu1  ;;  %v3884_v1 = vpop.f32.mrb[0].mxu0 }
  0xeb   : > { %v667_v21 = vpop.f32.mrb[1].mxu1  ;;  %v676_v23 = vadd.f32 %v3860_v19, %v3658_v20  ;;  %v843_v3 = vpop.f32.mrb[1].mxu0  ;;  %v852_v4 = vadd.f32 %v3884_v1, %v3672_v2 }
  0xec   : > { %v3861_v22 = vpop.f32.mrb[2].mxu1  ;;  %v668_v26 = vadd.f32 %v3658_v20, %v667_v21  ;;  %v3885_v5 = vpop.f32.mrb[2].mxu0  ;;  %v844_v7 = vadd.f32 %v3672_v2, %v843_v3 }
  0xed   : > { %v679_v24 = vadd.f32 %v3861_v22, %v3658_v20  ;;  %v670_v25 = vpop.f32.mrb[3].mxu1  ;;  %v846_v6 = vpop.f32.mrb[3].mxu0  ;;  %v855_v8 = vadd.f32 %v3885_v5, %v3672_v2 }
  0xee   : > { %v671_v27 = vadd.f32 %v3658_v20, %v670_v25  ;;  %v847_v9 = vadd.f32 %v3672_v2, %v846_v6  ;;  %v887_v25 = vld [vmem:[%s5350_s9 + $0x8] sm:$0xff] }
  0xef   : > { %v4568_v28 = vpack.c.bf16 %v679_v24, %v676_v23  ;;  %v4618_v10 = vpack.c.bf16 %v855_v8, %v852_v4  ;;  %v886_v23 = vld [vmem:[%s5350_s9] sm:$0xff] }
  0xf0   : > { %v4570_v29 = vpack.c.bf16 %v671_v27, %v668_v26  ;;  %v4620_v11 = vpack.c.bf16 %v847_v9, %v844_v7 }
  0xf2   : > { %v3864_v30 = vpop.f32.mrb[4].mxu1  ;;  %v3888_v12 = vpop.f32.mrb[4].mxu0 }
  0xf3   : > { %v683_v31 = vpop.f32.mrb[5].mxu1  ;;  %v692_v33 = vadd.f32 %v3864_v30, %v3658_v20  ;;  %v868_v13 = vadd.f32 %v3888_v12, %v3672_v2  ;;  %v859_v14 = vpop.f32.mrb[5].mxu0 }
  0xf4   : > { %v3865_v32 = vpop.f32.mrb[6].mxu1  ;;  %v684_v36 = vadd.f32 %v3658_v20, %v683_v31  ;;  %v860_v15 = vadd.f32 %v3672_v2, %v859_v14  ;;  %v3889_v16 = vpop.f32.mrb[6].mxu0 }
  0xf5   : > { %v695_v34 = vadd.f32 %v3865_v32, %v3658_v20  ;;  %v686_v35 = vpop.f32.mrb[7].mxu1  ;;  %v871_v17 = vadd.f32 %v3889_v16, %v3672_v2  ;;  %v862_v19 = vpop.f32.mrb[7].mxu0 }
  0xf6   : > { %v687_v37 = vadd.f32 %v3658_v20, %v686_v35  ;;  %v863_v20 = vadd.f32 %v3672_v2, %v862_v19 }
  0xf7   : > { %v4572_v38 = vpack.c.bf16 %v695_v34, %v692_v33  ;;  %v4626_v21 = vpack.c.bf16 %v871_v17, %v868_v13 }
  0xf8   : > { %v4574_v39 = vpack.c.bf16 %v687_v37, %v684_v36  ;;  %v4628_v22 = vpack.c.bf16 %v863_v20, %v860_v15 }
  0xfa   : > { %v3872_v40 = vpop.f32.mrb[8].mxu1 }
  0xfb   : > { %v755_v42 = vpop.f32.mrb[9].mxu1  ;;  %v764_v44 = vadd.f32 %v3872_v40, %v3665_v41 }
  0xfc   : > { %v3873_v43 = vpop.f32.mrb[10].mxu1  ;;  %v756_v47 = vadd.f32 %v3665_v41, %v755_v42 }
  0xfd   : > { %v767_v45 = vadd.f32 %v3873_v43, %v3665_v41  ;;  %v758_v46 = vpop.f32.mrb[11].mxu1 }
  0xfe   : > { %v759_v48 = vadd.f32 %v3665_v41, %v758_v46 }
  0xff   : > { %v4579_v49 = vpack.c.bf16 %v767_v45, %v764_v44 }
 0x100   : > { %v4581_v50 = vpack.c.bf16 %v759_v48, %v756_v47 }
 0x101   : > { %v940_v62 = vsel %vm888_vm2, %v4579_v49, 0 }
 0x102   : > { %v3876_v51 = vpop.f32.mrb[12].mxu1  ;;  %v893_v52 = vsel %vm888_vm2, %v4581_v50, 0 }
 0x103   : > { %v780_v53 = vadd.f32 %v3876_v51, %v3665_v41  ;;  %v771_v54 = vpop.f32.mrb[13].mxu1  ;;  %3891 = vmatpush3.bf16.xpose.msra.mxu1 %v893_v52 }
 0x104   : > { %v772_v55 = vadd.f32 %v3665_v41, %v771_v54  ;;  %v3877_v56 = vpop.f32.mrb[14].mxu1  ;;  %3896 = vmatprep.subr.bf16.mxu1 %v4400_v18 }
 0x105   : > { %v783_v57 = vadd.f32 %v3877_v56, %v3665_v41  ;;  %v774_v58 = vpop.f32.mrb[15].mxu1 }
 0x106   : > { %v775_v59 = vadd.f32 %v3665_v41, %v774_v58 }
 0x107   : > { %v4586_v60 = vpack.c.bf16 %v783_v57, %v780_v53 }
 0x108   : > { %v4588_v61 = vpack.c.bf16 %v775_v59, %v772_v55 }
 0x109   : > { %v1034_v0 = vsel %vm888_vm2, %v4586_v60, 0 }
 0x10a   : > { %3893 = vmatmul.mubr.msk.bf16.vlgmr.msra.gmra.mrb[16].mxu1 %vm888_vm2, %v4570_v29  ;;  %v987_v63 = vsel %vm888_vm2, %v4588_v61, 0 }
 0x10b   : > { %3897 = vmatpush3.bf16.xpose.msra.mxu1 %v940_v62  ;;  %3903 = vmatpush3.bf16.xpose.msra.mxu0 %v987_v63 }
 0x10c   : > { %3898 = vmatprep.mubr.msk.bf16.mxu1 %vm4401_vm1, %v4400_v18  ;;  %3908 = vmatprep.subr.bf16.mxu1 %v4400_v18 }
 0x10d   : > { %3914 = vmatprep.subr.bf16.mxu0 %v4400_v18 }
 0x112   : > { %3899 = vmatmul.mubr.msk.bf16.vlgmr.msra.gmra.mrb[20].mxu1 %vm888_vm2, %v4568_v28  ;;  %3905 = vmatmul.mubr.msk.bf16.vlgmr.msra.gmra.mrb[8].mxu0 %vm888_vm2, %v4574_v39 }
 0x113   : > { %3909 = vmatpush3.bf16.xpose.msra.mxu1 %v1034_v0  ;;  %3910 = vmatprep.mubr.msk.bf16.mxu1 %vm4401_vm1, %v4400_v18 }
 0x114   : > { %3920 = vmatprep.subr.bf16.mxu1 %v4400_v18  ;;  %3916 = vmatprep.mubr.msk.bf16.mxu0 %vm4401_vm1, %v4400_v18 }
 0x115   : > { %3915 = vmatpush3.bf16.msra.mxu0 %v4620_v11 }
 0x116   : > { %3926 = vmatprep.subr.bf16.mxu0 %v4400_v18 }
 0x11a   : > { %3911 = vmatmul.mubr.msk.bf16.vlgmr.msra.gmra.mrb[24].mxu1 %vm888_vm2, %v4572_v38 }
 0x11b   : > { %3922 = vmatprep.mubr.msk.bf16.mxu1 %vm4401_vm1, %v4400_v18  ;;  %3921 = vmatpush3.bf16.msra.mxu1 %v4618_v10 }
 0x11c   : > { %3932 = vmatprep.subr.bf16.mxu1 %v4400_v18 }
 0x1dd   : > { %v929_v24 = vpop.f32.mrb[16].mxu1 }
 0x1de   : > { %v930_v26 = vadd.f32 %v929_v24, %v886_v23  ;;  %v3894_v27 = vpop.f32.mrb[17].mxu1 }
 0x1df   : > { %v932_v30 = vpop.f32.mrb[18].mxu1 }
 0x1e0   : > { %v933_v31 = vadd.f32 %v932_v30, %v887_v25  ;;  %v3895_v32 = vpop.f32.mrb[19].mxu1  ;;  %v1078_v33 = vsel %vm1077_vm3, %v930_v26, -inf }
 0x1e1   : > { %1079 = vmax.xlane.f32.xlu0 %v1078_v33 }
 0x1e2   : > { %v1081_v34 = vsel %vm1077_vm3, %v933_v31, -inf }
 0x1e5   : > { %v1023_v35 = vpop.f32.mrb[8].mxu0  ;;  %1082 = vmax.xlane.f32.xlu0 %v1081_v34  ;;  %v976_v36 = vpop.f32.mrb[20].mxu1 }
 0x1e6   : > { %v1024_v37 = vadd.f32 %v1023_v35, %v886_v23  ;;  %v977_v40 = vadd.f32 %v976_v36, %v886_v23  ;;  %v3900_v41 = vpop.f32.mrb[21].mxu1  ;;  %v3906_v42 = vpop.f32.mrb[9].mxu0 }
 0x1e7   : > { %v979_v43 = vpop.f32.mrb[22].mxu1  ;;  %v1026_v44 = vpop.f32.mrb[10].mxu0 }
 0x1e8   : > { %v980_v45 = vadd.f32 %v979_v43, %v887_v25  ;;  %v3901_v46 = vpop.f32.mrb[23].mxu1  ;;  %v3907_v47 = vpop.f32.mrb[11].mxu0  ;;  %v1090_v48 = vsel %vm1077_vm3, %v1024_v37, -inf  ;;  %v1084_v51 = vsel %vm1077_vm3, %v977_v40, -inf  ;;  %v1027_v52 = vadd.f32 %v1026_v44, %v887_v25 }
 0x1e9   : > { %1091 = vmax.xlane.f32.xlu0 %v1090_v48  ;;  %1085 = vmax.xlane.f32.xlu1 %v1084_v51 }
 0x1ea   : > { %v1087_v53 = vsel %vm1077_vm3, %v980_v45, -inf  ;;  %v1093_v62 = vsel %vm1077_vm3, %v1027_v52, -inf }
 0x1ed   : > { %1088 = vmax.xlane.f32.xlu1 %v1087_v53  ;;  %v1070_v54 = vpop.f32.mrb[24].mxu1 }
 0x1ee   : > { %v1071_v55 = vadd.f32 %v1070_v54, %v886_v23  ;;  %v3912_v56 = vpop.f32.mrb[25].mxu1 }
 0x1ef   : > { %v1073_v57 = vpop.f32.mrb[26].mxu1 }
 0x1f0   : > { %v4641_v58 = vadd.f32 %v1073_v57, %v887_v25  ;;  %v3913_v59 = vpop.f32.mrb[27].mxu1  ;;  %v1096_v63 = vsel %vm1077_vm3, %v1071_v55, -inf }
 0x1f1   : > { %1094 = vmax.xlane.f32.xlu1 %v1093_v62  ;;  %1097 = vmax.xlane.f32.xlu0 %v1096_v63 }
 0x1f2   : > { %v1099_v0 = vsel %vm1077_vm3, %v4641_v58, -inf }
 0x1f5   : > { %1100 = vmax.xlane.f32.xlu1 %v1099_v0 }
 0x26e   : > { %v1080_v1 = vpop.xlane.xlu0 %1079 }
 0x26f   : > { %v1102_v2 = vsub.f32 %v930_v26, %v1080_v1 }
 0x271   : > { %v1110_v3 = vmul.f32 1.442695, %v1102_v2 }
 0x272   : > { %v1083_v4 = vpop.xlane.xlu0 %1082 }
 0x273   : > { %4224 = vpow2.f32 %v1110_v3  ;;  %v1103_v5 = vsub.f32 %v933_v31, %v1083_v4 }
 0x275   : > { %v1112_v6 = vmul.f32 1.442695, %v1103_v5 }
 0x276   : > { %v1092_v7 = vpop.xlane.xlu0 %1091  ;;  %v1086_v8 = vpop.xlane.xlu1 %1085 }
 0x277   : > { %4226 = vpow2.f32 %v1112_v6  ;;  %v1106_v9 = vsub.f32 %v1024_v37, %v1092_v7  ;;  %v1104_v12 = vsub.f32 %v977_v40, %v1086_v8 }
 0x279   : > { %v1114_v13 = vmul.f32 1.442695, %v1104_v12  ;;  %v1118_v14 = vmul.f32 1.442695, %v1106_v9 }
 0x27a   : > { %v1089_v15 = vpop.xlane.xlu1 %1088 }
 0x27b   : > { %v1105_v16 = vsub.f32 %v980_v45, %v1089_v15  ;;  %4228 = vpow2.f32 %v1114_v13 }
 0x27c   : > { %4230 = vpow2.f32 %v1118_v14 }
 0x27d   : > { %v4225_v17 = vpop.eup %4224  ;;  %v1116_v19 = vmul.f32 1.442695, %v1105_v16 }
 0x27e   : > { %v1095_v20 = vpop.xlane.xlu1 %1094  ;;  %v1098_v23 = vpop.xlane.xlu0 %1097  ;;  %v1126_v24 = vsel %vm1077_vm3, %v4225_v17, 0.0 }
 0x27f   : > { %4232 = vpow2.f32 %v1116_v19  ;;  %v1107_v25 = vsub.f32 %v1027_v52, %v1095_v20  ;;  %v1108_v26 = vsub.f32 %v1071_v55, %v1098_v23  ;;  %1127 = vadd.xlane.f32.xlu0 %v1126_v24 }
 0x281   : > { %v4227_v27 = vpop.eup %4226  ;;  %v1120_v30 = vmul.f32 1.442695, %v1107_v25  ;;  %v1122_v31 = vmul.f32 1.442695, %v1108_v26 }
 0x282   : > { %v1129_v32 = vsel %vm1077_vm3, %v4227_v27, 0.0  ;;  %v1101_v45 = vpop.xlane.xlu1 %1100 }
 0x283   : > { %4234 = vpow2.f32 %v1120_v30  ;;  %1130 = vadd.xlane.f32.xlu1 %v1129_v32  ;;  %v1109_v46 = vsub.f32 %v4641_v58, %v1101_v45 }
 0x284   : > { %4236 = vpow2.f32 %v1122_v31 }
 0x285   : > { %v4229_v33 = vpop.eup %4228  ;;  %v1124_v47 = vmul.f32 1.442695, %v1109_v46 }
 0x286   : > { %v1132_v34 = vsel %vm1077_vm3, %v4229_v33, 0.0  ;;  %v4231_v35 = vpop.eup %4230 }
 0x287   : > { %1133 = vadd.xlane.f32.xlu0 %v1132_v34  ;;  %v1138_v40 = vsel %vm1077_vm3, %v4231_v35, 0.0  ;;  %4238 = vpow2.f32 %v1124_v47 }
 0x289   : > { %v4233_v36 = vpop.eup %4232 }
 0x28a   : > { %v1135_v37 = vsel %vm1077_vm3, %v4233_v36, 0.0 }
 0x28b   : > { %1136 = vadd.xlane.f32.xlu1 %v1135_v37  ;;  %1139 = vadd.xlane.f32.xlu0 %v1138_v40 }
 0x28d   : > { %v4235_v41 = vpop.eup %4234 }
 0x28e   : > { %v4652_v42 = vpop.eup %4236  ;;  %v1141_v43 = vsel %vm1077_vm3, %v4235_v41, 0.0 }
 0x28f   : > { %v1144_v44 = vsel %vm1077_vm3, %v4652_v42, 0.0  ;;  %1142 = vadd.xlane.f32.xlu1 %v1141_v43 }
 0x290   : > { %1145 = vadd.xlane.f32.xlu0 %v1144_v44 }
 0x291   : > { %v4668_v48 = vpop.eup %4238 }
 0x292   : > { %v1147_v51 = vsel %vm1077_vm3, %v4668_v48, 0.0 }
 0x2a0   : > { %1406 = vrot.lane.b32.xlu1 %v4579_v49, %s4402_s25 }
 0x2a4   : > { %1350 = vrot.lane.b32.xlu1 %v4570_v29, %s4402_s25 }
 0x2a6   : > { %1353 = vrot.lane.b32.xlu0 %v4581_v50, %s4402_s25 }
 0x2aa   : > { %1403 = vrot.lane.b32.xlu0 %v4568_v28, %s4402_s25 }
 0x2ae   : > { %1456 = vrot.lane.b32.xlu0 %v4574_v39, %s4402_s25 }
 0x2c8   : > { %1148 = vadd.xlane.f32.xlu1 %v1147_v51 }
 0x2d9   : > { %1459 = vrot.lane.b32.xlu1 %v4588_v61, %s4402_s25 }
 0x2dd   : > { %1512 = vrot.lane.b32.xlu1 %v4586_v60, %s4402_s25 }
 0x2e1   : > { %1509 = vrot.lane.b32.xlu1 %v4572_v38, %s4402_s25 }
 0x30c   : > { %v1128_v52 = vpop.xlane.xlu0 %1127 }
 0x30d   : > { %4240 = vrcp.f32 %v1128_v52 }
 0x310   : > { %v1131_v53 = vpop.xlane.xlu1 %1130 }
 0x311   : > { %4242 = vrcp.f32 %v1131_v53  ;;  %v3687_v53 = vld [vmem:[%s5350_s9 + $0x10] sm:$0xff] }
 0x314   : > { %v1134_v54 = vpop.xlane.xlu0 %1133 }
 0x315   : > { %4244 = vrcp.f32 %v1134_v54 }
 0x317   : > { %v4241_v56 = vpop.eup %4240 }
 0x318   : > { %v1137_v55 = vpop.xlane.xlu1 %1136  ;;  %v1140_v57 = vpop.xlane.xlu0 %1139  ;;  %v1158_v59 = vmul.f32 %v4241_v56, %v4225_v17 }
 0x319   : > { %4246 = vrcp.f32 %v1137_v55  ;;  %v3688_v55 = vld [vmem:[%s5350_s9 + $0x18] sm:$0xff] }
 0x31a   : > { %4248 = vrcp.f32 %v1140_v57 }
 0x31b   : > { %v4243_v58 = vpop.eup %4242 }
 0x31c   : > { %v1159_v62 = vmul.f32 %v4243_v58, %v4227_v27  ;;  %v1143_v63 = vpop.xlane.xlu1 %1142 }
 0x31d   : > { %4250 = vrcp.f32 %v1143_v63  ;;  %v1146_v3 = vpop.xlane.xlu0 %1145 }
 0x31e   : > { %v1166_v0 = vpack.c.bf16 %v1159_v62, %v1158_v59  ;;  %4252 = vrcp.f32 %v1146_v3 }
 0x31f   : > { %v4245_v1 = vpop.eup %4244 }
 0x320   : > { %3917 = vmatmul.mubr.msk.bf16.vlgmr.msra.gmra.mrb[12].mxu0 %vm1077_vm3, %v1166_v0  ;;  %v1160_v4 = vmul.f32 %v4245_v1, %v4229_v33  ;;  %v1407_v16 = vpop.permute.xlu1 %1406 }
 0x321   : > { %3927 = vmatpush3.bf16.msra.mxu0 %v4628_v22  ;;  %3928 = vmatprep.mubr.msk.bf16.mxu0 %vm4401_vm1, %v4400_v18  ;;  %v1354_v13 = vpop.permute.xlu0 %1353  ;;  %v1412_v33 = vsel %vm888_vm2, %v1407_v16, 0 }
 0x322   : > { %3938 = vmatprep.subr.bf16.mxu0 %v4400_v18  ;;  %v1359_v15 = vsel %vm888_vm2, %v1354_v13, 0 }
 0x323   : > { %v4247_v2 = vpop.eup %4246 }
 0x324   : > { %v1161_v5 = vmul.f32 %v4247_v2, %v4233_v36  ;;  %v4249_v6 = vpop.eup %4248  ;;  %v1351_v17 = vpop.permute.xlu1 %1350 }
 0x325   : > { %v1162_v9 = vmul.f32 %v4249_v6, %v4231_v35  ;;  %v1404_v24 = vpop.permute.xlu0 %1403 }
 0x326   : > { %v1167_v7 = vpack.c.bf16 %v1161_v5, %v1160_v4 }
 0x327   : > { %v4251_v8 = vpop.eup %4250 }
 0x328   : > { %v1163_v12 = vmul.f32 %v4251_v8, %v4235_v41  ;;  %3923 = vmatmul.mubr.msk.bf16.vlgmr.msra.gmra.mrb[28].mxu1 %vm1077_vm3, %v1167_v7  ;;  %v4253_v25 = vpop.eup %4252 }
 0x329   : > { %3933 = vmatpush3.bf16.msra.mxu1 %v4626_v21  ;;  %3934 = vmatprep.mubr.msk.bf16.mxu1 %vm4401_vm1, %v4400_v18  ;;  %v1164_v27 = vmul.f32 %v4253_v25, %v4652_v42  ;;  %v1457_v30 = vpop.permute.xlu0 %1456 }
 0x32a   : > { %v1168_v14 = vpack.c.bf16 %v1163_v12, %v1162_v9  ;;  %3944 = vmatprep.subr.bf16.mxu1 %v4400_v18 }
 0x32c   : > { %3929 = vmatmul.mubr.msk.bf16.vlgmr.msra.gmra.mrb[16].mxu0 %vm1077_vm3, %v1168_v14 }
 0x32d   : > { %3939 = vmatpush3.bf16.xpose.msra.mxu0 %v1359_v15  ;;  %3940 = vmatprep.mubr.msk.bf16.mxu0 %vm4401_vm1, %v4400_v18 }
 0x32e   : > { %3950 = vmatprep.subr.bf16.mxu0 %v4400_v18 }
 0x334   : > { %3941 = vmatmul.mubr.msk.bf16.vlgmr.msra.gmra.mrb[20].mxu0 %vm888_vm2, %v1351_v17 }
 0x335   : > { %3952 = vmatprep.mubr.msk.bf16.mxu0 %vm4401_vm1, %v4400_v18 }
 0x355   : > { %v1149_v19 = vpop.xlane.xlu1 %1148 }
 0x356   : > { %4254 = vrcp.f32 %v1149_v19 }
 0x359   : > { %v1460_v20 = vpop.permute.xlu1 %1459 }
 0x35a   : > { %v1465_v23 = vsel %vm888_vm2, %v1460_v20, 0 }
 0x35b   : > { %3951 = vmatpush3.bf16.xpose.msra.mxu0 %v1465_v23 }
 0x35c   : > { %3962 = vmatprep.subr.bf16.mxu0 %v4400_v18 }
 0x35d   : > { %v1513_v34 = vpop.permute.xlu1 %1512 }
 0x35e   : > { %v1518_v35 = vsel %vm888_vm2, %v1513_v34, 0 }
 0x360   : > { %v4255_v26 = vpop.eup %4254 }
 0x361   : > { %v1165_v31 = vmul.f32 %v4255_v26, %v4668_v48  ;;  %v1510_v36 = vpop.permute.xlu1 %1509 }
 0x362   : > { %3953 = vmatmul.mubr.msk.bf16.vlgmr.msra.gmra.mrb[24].mxu0 %vm888_vm2, %v1457_v30 }
 0x363   : > { %v1169_v32 = vpack.c.bf16 %v1165_v31, %v1164_v27  ;;  %3964 = vmatprep.mubr.msk.bf16.mxu0 %vm4401_vm1, %v4400_v18 }
 0x365   : > { %3935 = vmatmul.mubr.msk.bf16.vlgmr.msra.gmra.mrb[32].mxu1 %vm1077_vm3, %v1169_v32 }
 0x366   : > { %3945 = vmatpush3.bf16.xpose.msra.mxu1 %v1412_v33  ;;  %3946 = vmatprep.mubr.msk.bf16.mxu1 %vm4401_vm1, %v4400_v18 }
 0x367   : > { %3956 = vmatprep.subr.bf16.mxu1 %v4400_v18 }
 0x36d   : > { %3947 = vmatmul.mubr.msk.bf16.vlgmr.msra.gmra.mrb[36].mxu1 %vm888_vm2, %v1404_v24 }
 0x36e   : > { %3957 = vmatpush3.bf16.xpose.msra.mxu1 %v1518_v35  ;;  %3958 = vmatprep.mubr.msk.bf16.mxu1 %vm4401_vm1, %v4400_v18 }
 0x36f   : > { %3968 = vmatprep.subr.bf16.mxu1 %v4400_v18 }
 0x375   : > { %3959 = vmatmul.mubr.msk.bf16.vlgmr.msra.gmra.mrb[40].mxu1 %vm888_vm2, %v1510_v36 }
 0x376   : > { %3970 = vmatprep.mubr.msk.bf16.mxu1 %vm4401_vm1, %v4400_v18 }
 0x3f3   : > { %v4716_v37 = vpop.f32.mrb[12].mxu0 }
 0x3f4   : > { %v3918_v40 = vpop.f32.mrb[13].mxu0 }
 0x3f5   : > { %v4718_v41 = vpop.f32.mrb[14].mxu0 }
 0x3f6   : > { %v3919_v42 = vpop.f32.mrb[15].mxu0 }
 0x3fb   : > { %v4720_v43 = vpop.f32.mrb[28].mxu1 }
 0x3fc   : > { %v3924_v44 = vpop.f32.mrb[29].mxu1 }
 0x3fd   : > { %v4722_v45 = vpop.f32.mrb[30].mxu1 }
 0x3fe   : > { %v3925_v46 = vpop.f32.mrb[31].mxu1 }
 0x3ff   : > { %v4724_v47 = vpop.f32.mrb[16].mxu0 }
 0x400   : > { %v3930_v48 = vpop.f32.mrb[17].mxu0 }
 0x401   : > { %v4726_v51 = vpop.f32.mrb[18].mxu0 }
 0x402   : > { %v3931_v52 = vpop.f32.mrb[19].mxu0 }
 0x407   : > { %v1395_v54 = vpop.f32.mrb[20].mxu0 }
 0x408   : > { %v1396_v56 = vadd.f32 %v3687_v53, %v1395_v54  ;;  %v3942_v57 = vpop.f32.mrb[21].mxu0 }
 0x409   : > { %v1398_v58 = vpop.f32.mrb[22].mxu0 }
 0x40a   : > { %v1399_v59 = vadd.f32 %v3688_v55, %v1398_v58  ;;  %v3943_v62 = vpop.f32.mrb[23].mxu0  ;;  %v1561_v63 = vsel %vm1077_vm3, %v1396_v56, -inf }
 0x40b   : > { %1562 = vmax.xlane.f32.xlu0 %v1561_v63 }
 0x40c   : > { %v1564_v0 = vsel %vm1077_vm3, %v1399_v59, -inf }
 0x40d   : > { %1565 = vmax.xlane.f32.xlu1 %v1564_v0 }
 0x435   : > { %v1501_v1 = vpop.f32.mrb[24].mxu0 }
 0x436   : > { %v3954_v2 = vpop.f32.mrb[25].mxu0  ;;  %v1502_v23 = vadd.f32 %v3687_v53, %v1501_v1 }
 0x437   : > { %v1504_v3 = vpop.f32.mrb[26].mxu0 }
 0x438   : > { %v1505_v4 = vadd.f32 %v3688_v55, %v1504_v3  ;;  %v4736_v5 = vpop.f32.mrb[32].mxu1  ;;  %v3955_v6 = vpop.f32.mrb[27].mxu0  ;;  %v1573_v32 = vsel %vm1077_vm3, %v1502_v23, -inf }
 0x439   : > { %v3936_v7 = vpop.f32.mrb[33].mxu1 }
 0x43a   : > { %v4738_v8 = vpop.f32.mrb[34].mxu1  ;;  %v1576_v9 = vsel %vm1077_vm3, %v1505_v4, -inf }
 0x43b   : > { %1577 = vmax.xlane.f32.xlu1 %v1576_v9  ;;  %v3937_v12 = vpop.f32.mrb[35].mxu1 }
 0x440   : > { %v1448_v13 = vpop.f32.mrb[36].mxu1 }
 0x441   : > { %v1449_v14 = vadd.f32 %v3687_v53, %v1448_v13  ;;  %v3948_v15 = vpop.f32.mrb[37].mxu1 }
 0x442   : > { %v1451_v16 = vpop.f32.mrb[38].mxu1 }
 0x443   : > { %v1452_v17 = vadd.f32 %v3688_v55, %v1451_v16  ;;  %v3949_v19 = vpop.f32.mrb[39].mxu1  ;;  %v1567_v20 = vsel %vm1077_vm3, %v1449_v14, -inf }
 0x444   : > { %1568 = vmax.xlane.f32.xlu0 %v1567_v20 }
 0x445   : > { %v1570_v24 = vsel %vm1077_vm3, %v1452_v17, -inf }
 0x448   : > { %1571 = vmax.xlane.f32.xlu0 %v1570_v24  ;;  %v1554_v25 = vpop.f32.mrb[40].mxu1 }
 0x449   : > { %v3960_v26 = vpop.f32.mrb[41].mxu1  ;;  %v1555_v30 = vadd.f32 %v3687_v53, %v1554_v25 }
 0x44a   : > { %v1557_v27 = vpop.f32.mrb[42].mxu1 }
 0x44b   : > { %v3961_v31 = vpop.f32.mrb[43].mxu1  ;;  %v1579_v33 = vsel %vm1077_vm3, %v1555_v30, -inf  ;;  %v4751_v34 = vadd.f32 %v3688_v55, %v1557_v27 }
 0x44c   : > { %1702 = vrot.lane.b32.xlu1 %v4618_v10, %s4402_s25  ;;  %1574 = vmax.xlane.f32.xlu0 %v1573_v32 }
 0x44d   : > { %v1582_v35 = vsel %vm1077_vm3, %v4751_v34, -inf }
 0x450   : > { %1750 = vrot.lane.b32.xlu1 %v4628_v22, %s4402_s25  ;;  %1580 = vmax.xlane.f32.xlu0 %v1579_v33 }
 0x466   : > { %1654 = vrot.lane.b32.xlu0 %v4620_v11, %s4402_s25 }
 0x474   : > { %1583 = vmax.xlane.f32.xlu1 %v1582_v35 }
 0x485   : > { %1798 = vrot.lane.b32.xlu1 %v4626_v21, %s4402_s25  ;;  %s5316_s25 = scalar_lea.vmem %s5359_s18, %s3746_s23 }
 0x498   : > { %v1563_v36 = vpop.xlane.xlu0 %1562 }
 0x499   : > { %v1585_v40 = vsub.f32 %v1396_v56, %v1563_v36 }
 0x49a   : > { %v1566_v42 = vpop.xlane.xlu1 %1565 }
 0x49b   : > { %v1593_v44 = vmul.f32 1.442695, %v1585_v40  ;;  %v1586_v46 = vsub.f32 %v1399_v59, %v1566_v42 }
 0x49d   : > { %4256 = vpow2.f32 %v1593_v44  ;;  %v1595_v48 = vmul.f32 1.442695, %v1586_v46 }
 0x49f   : > { %4258 = vpow2.f32 %v1595_v48 }
 0x4a7   : > { %v4757_v52 = vpop.eup %4256 }
 0x4a8   : > { %v1609_v53 = vsel %vm1077_vm3, %v4757_v52, 0.0 }
 0x4a9   : > { %v4761_v54 = vpop.eup %4258  ;;  %1610 = vadd.xlane.f32.xlu0 %v1609_v53 }
 0x4aa   : > { %v1612_v55 = vsel %vm1077_vm3, %v4761_v54, 0.0 }
 0x4ab   : > { %1613 = vadd.xlane.f32.xlu1 %v1612_v55 }
 0x4c8   : > { %v1578_v57 = vpop.xlane.xlu1 %1577 }
 0x4c9   : > { %v1590_v62 = vsub.f32 %v1505_v4, %v1578_v57 }
 0x4cb   : > { %v1603_v2 = vmul.f32 1.442695, %v1590_v62 }
 0x4cc   : > { %v1703_v56 = vpop.permute.xlu1 %1702 }
 0x4cd   : > { %3969 = vmatpush3.bf16.msra.mxu1 %v1703_v56 }
 0x4ce   : > { %3980 = vmatprep.subr.bf16.mxu1 %v4400_v18 }
 0x4d1   : > { %v1569_v58 = vpop.xlane.xlu0 %1568 }
 0x4d2   : > { %v1587_v59 = vsub.f32 %v1449_v14, %v1569_v58 }
 0x4d4   : > { %v1597_v63 = vmul.f32 1.442695, %v1587_v59 }
 0x4d5   : > { %v1572_v0 = vpop.xlane.xlu0 %1571 }
 0x4d6   : > { %4260 = vpow2.f32 %v1597_v63  ;;  %v1588_v1 = vsub.f32 %v1452_v17, %v1572_v0 }
 0x4d8   : > { %v1599_v3 = vmul.f32 1.442695, %v1588_v1 }
 0x4d9   : > { %v1575_v6 = vpop.xlane.xlu0 %1574 }
 0x4da   : > { %4262 = vpow2.f32 %v1599_v3  ;;  %v1589_v7 = vsub.f32 %v1502_v23, %v1575_v6 }
 0x4db   : > { %4264 = vpow2.f32 %v1603_v2 }
 0x4dc   : > { %v1601_v9 = vmul.f32 1.442695, %v1589_v7 }
 0x4dd   : > { %v1581_v12 = vpop.xlane.xlu0 %1580 }
 0x4de   : > { %4266 = vpow2.f32 %v1601_v9  ;;  %v1591_v13 = vsub.f32 %v1555_v30, %v1581_v12  ;;  %v1751_v30 = vpop.permute.xlu1 %1750 }
 0x4e0   : > { %v4261_v15 = vpop.eup %4260  ;;  %v1605_v16 = vmul.f32 1.442695, %v1591_v13 }
 0x4e1   : > { %v1655_v19 = vpop.permute.xlu0 %1654  ;;  %v1615_v14 = vsel %vm1077_vm3, %v4261_v15, 0.0 }
 0x4e2   : > { %4268 = vpow2.f32 %v1605_v16  ;;  %1616 = vadd.xlane.f32.xlu0 %v1615_v14  ;;  %3963 = vmatpush3.bf16.msra.mxu0 %v1655_v19 }
 0x4e3   : > { %3974 = vmatprep.subr.bf16.mxu0 %v4400_v18 }
 0x4e4   : > { %v4263_v4 = vpop.eup %4262 }
 0x4e5   : > { %v1618_v17 = vsel %vm1077_vm3, %v4263_v4, 0.0  ;;  %v4265_v20 = vpop.eup %4264 }
 0x4e6   : > { %1619 = vadd.xlane.f32.xlu1 %v1618_v17  ;;  %v1624_v25 = vsel %vm1077_vm3, %v4265_v20, 0.0 }
 0x4e8   : > { %v4267_v23 = vpop.eup %4266 }
 0x4e9   : > { %v1621_v24 = vsel %vm1077_vm3, %v4267_v23, 0.0 }
 0x4ea   : > { %1622 = vadd.xlane.f32.xlu0 %v1621_v24  ;;  %1625 = vadd.xlane.f32.xlu1 %v1624_v25 }
 0x4ec   : > { %v4771_v26 = vpop.eup %4268 }
 0x4ed   : > { %v1627_v27 = vsel %vm1077_vm3, %v4771_v26, 0.0 }
 0x4ee   : > { %1628 = vadd.xlane.f32.xlu0 %v1627_v27 }
 0x4fb   : > { %1901 = vrot.lane.b32.xlu1 %v4579_v49, %s4403_s20 }
 0x501   : > { %v1584_v31 = vpop.xlane.xlu1 %1583 }
 0x502   : > { %v1592_v32 = vsub.f32 %v4751_v34, %v1584_v31 }
 0x504   : > { %1850 = vrot.lane.b32.xlu0 %v4581_v50, %s4403_s20  ;;  %v1607_v33 = vmul.f32 1.442695, %v1592_v32 }
 0x505   : > { %v1799_v40 = vpop.permute.xlu1 %1798 }
 0x506   : > { %4270 = vpow2.f32 %v1607_v33 }
 0x508   : > { %1848 = vrot.lane.b32.xlu0 %v4570_v29, %s4403_s20 }
 0x50c   : > { %1899 = vrot.lane.b32.xlu0 %v4568_v28, %s4403_s20 }
 0x510   : > { %1950 = vrot.lane.b32.xlu0 %v4574_v39, %s4403_s20  ;;  %v4786_v35 = vpop.eup %4270 }
 0x511   : > { %v1630_v36 = vsel %vm1077_vm3, %v4786_v35, 0.0 }
 0x51f   : > { %1631 = vadd.xlane.f32.xlu1 %v1630_v36 }
 0x530   : > { %1952 = vrot.lane.b32.xlu1 %v4588_v61, %s4403_s20 }
 0x534   : > { %2003 = vrot.lane.b32.xlu1 %v4586_v60, %s4403_s20 }
 0x536   : > { %v1611_v34 = vpop.xlane.xlu0 %1610 }
 0x537   : > { %4272 = vrcp.f32 %v1611_v34 }
 0x538   : > { %2001 = vrot.lane.b32.xlu1 %v4572_v38, %s4403_s20  ;;  %v1614_v42 = vpop.xlane.xlu1 %1613 }
 0x539   : > { %4274 = vrcp.f32 %v1614_v42 }
 0x541   : > { %v4273_v44 = vpop.eup %4272 }
 0x542   : > { %v1641_v48 = vmul.f32 %v4273_v44, %v4757_v52 }
 0x543   : > { %v4275_v46 = vpop.eup %4274 }
 0x544   : > { %v1642_v53 = vmul.f32 %v4275_v46, %v4761_v54 }
 0x546   : > { %v1649_v55 = vpack.c.bf16 %v1642_v53, %v1641_v48 }
 0x548   : > { %3965 = vmatmul.mubr.msk.bf16.vlgmr.msra.gmra.mrb[28].mxu0 %vm1077_vm3, %v1649_v55 }
 0x549   : > { %3975 = vmatpush3.bf16.msra.mxu0 %v1751_v30  ;;  %3976 = vmatprep.mubr.msk.bf16.mxu0 %vm4401_vm1, %v4400_v18 }
 0x54a   : > { %3986 = vmatprep.subr.bf16.mxu0 %v4400_v18 }
 0x56f   : > { %v1617_v57 = vpop.xlane.xlu0 %1616 }
 0x570   : > { %4276 = vrcp.f32 %v1617_v57 }
 0x573   : > { %v1620_v56 = vpop.xlane.xlu1 %1619 }
 0x574   : > { %4278 = vrcp.f32 %v1620_v56 }
 0x577   : > { %v1623_v58 = vpop.xlane.xlu0 %1622  ;;  %v1626_v59 = vpop.xlane.xlu1 %1625 }
 0x578   : > { %4280 = vrcp.f32 %v1623_v58 }
 0x579   : > { %4282 = vrcp.f32 %v1626_v59 }
 0x57a   : > { %v4277_v52 = vpop.eup %4276 }
 0x57b   : > { %v1643_v54 = vmul.f32 %v4277_v52, %v4261_v15  ;;  %v1629_v0 = vpop.xlane.xlu0 %1628  ;;  %v1902_v16 = vpop.permute.xlu1 %1901 }
 0x57c   : > { %4284 = vrcp.f32 %v1629_v0  ;;  %v1907_v31 = vsel %vm888_vm2, %v1902_v16, 0 }
 0x57e   : > { %v4279_v62 = vpop.eup %4278 }
 0x57f   : > { %v1644_v63 = vmul.f32 %v4279_v62, %v4263_v4  ;;  %v1851_v9 = vpop.permute.xlu0 %1850  ;;  %v3697_v62 = vld [vmem:[%s5350_s9 + $0x20] sm:$0xff] }
 0x580   : > { %v1856_v13 = vsel %vm888_vm2, %v1851_v9, 0 }
 0x581   : > { %v1650_v1 = vpack.c.bf16 %v1644_v63, %v1643_v54  ;;  %v3698_v63 = vld [vmem:[%s5350_s9 + $0x28] sm:$0xff] }
 0x582   : > { %v4281_v2 = vpop.eup %4280 }
 0x583   : > { %v4283_v3 = vpop.eup %4282  ;;  %v1645_v6 = vmul.f32 %v4281_v2, %v4267_v23  ;;  %3971 = vmatmul.mubr.msk.bf16.vlgmr.msra.gmra.mrb[44].mxu1 %vm1077_vm3, %v1650_v1  ;;  %v1849_v15 = vpop.permute.xlu0 %1848 }
 0x584   : > { %v1646_v7 = vmul.f32 %v4283_v3, %v4265_v20  ;;  %3981 = vmatpush3.bf16.msra.mxu1 %v1799_v40  ;;  %3982 = vmatprep.mubr.msk.bf16.mxu1 %vm4401_vm1, %v4400_v18 }
 0x585   : > { %3992 = vmatprep.subr.bf16.mxu1 %v4400_v18 }
 0x586   : > { %v1651_v12 = vpack.c.bf16 %v1646_v7, %v1645_v6  ;;  %v4285_v20 = vpop.eup %4284 }
 0x587   : > { %v1900_v17 = vpop.permute.xlu0 %1899  ;;  %v1647_v24 = vmul.f32 %v4285_v20, %v4771_v26 }
 0x588   : > { %3977 = vmatmul.mubr.msk.bf16.vlgmr.msra.gmra.mrb[32].mxu0 %vm1077_vm3, %v1651_v12 }
 0x589   : > { %3987 = vmatpush3.bf16.xpose.msra.mxu0 %v1856_v13  ;;  %3988 = vmatprep.mubr.msk.bf16.mxu0 %vm4401_vm1, %v4400_v18 }
 0x58a   : > { %3998 = vmatprep.subr.bf16.mxu0 %v4400_v18 }
 0x58b   : > { %v1951_v25 = vpop.permute.xlu0 %1950 }
 0x590   : > { %3989 = vmatmul.mubr.msk.bf16.vlgmr.msra.gmra.mrb[36].mxu0 %vm888_vm2, %v1849_v15 }
 0x591   : > { %4000 = vmatprep.mubr.msk.bf16.mxu0 %vm4401_vm1, %v4400_v18 }
 0x5ac   : > { %v1632_v19 = vpop.xlane.xlu1 %1631 }
 0x5ad   : > { %4286 = vrcp.f32 %v1632_v19 }
 0x5b0   : > { %v1953_v14 = vpop.permute.xlu1 %1952 }
 0x5b1   : > { %v1958_v4 = vsel %vm888_vm2, %v1953_v14, 0 }
 0x5b2   : > { %3999 = vmatpush3.bf16.xpose.msra.mxu0 %v1958_v4 }
 0x5b3   : > { %4010 = vmatprep.subr.bf16.mxu0 %v4400_v18 }
 0x5b4   : > { %v2004_v26 = vpop.permute.xlu1 %2003 }
 0x5b5   : > { %v2009_v32 = vsel %vm888_vm2, %v2004_v26, 0 }
 0x5b7   : > { %v4287_v23 = vpop.eup %4286 }
 0x5b8   : > { %v1648_v27 = vmul.f32 %v4287_v23, %v4786_v35  ;;  %v2002_v33 = vpop.permute.xlu1 %2001 }
 0x5b9   : > { %4001 = vmatmul.mubr.msk.bf16.vlgmr.msra.gmra.mrb[40].mxu0 %vm888_vm2, %v1951_v25 }
 0x5ba   : > { %v1652_v30 = vpack.c.bf16 %v1648_v27, %v1647_v24  ;;  %4012 = vmatprep.mubr.msk.bf16.mxu0 %vm4401_vm1, %v4400_v18 }
 0x5bc   : > { %3983 = vmatmul.mubr.msk.bf16.vlgmr.msra.gmra.mrb[48].mxu1 %vm1077_vm3, %v1652_v30 }
 0x5bd   : > { %3993 = vmatpush3.bf16.xpose.msra.mxu1 %v1907_v31  ;;  %3994 = vmatprep.mubr.msk.bf16.mxu1 %vm4401_vm1, %v4400_v18 }
 0x5be   : > { %4004 = vmatprep.subr.bf16.mxu1 %v4400_v18 }
 0x5c4   : > { %3995 = vmatmul.mubr.msk.bf16.vlgmr.msra.gmra.mrb[52].mxu1 %vm888_vm2, %v1900_v17 }
 0x5c5   : > { %4005 = vmatpush3.bf16.xpose.msra.mxu1 %v2009_v32  ;;  %4006 = vmatprep.mubr.msk.bf16.mxu1 %vm4401_vm1, %v4400_v18 }
 0x5c6   : > { %4016 = vmatprep.subr.bf16.mxu1 %v4400_v18 }
 0x5cc   : > { %4007 = vmatmul.mubr.msk.bf16.vlgmr.msra.gmra.mrb[56].mxu1 %vm888_vm2, %v2002_v33 }
 0x5cd   : > { %4018 = vmatprep.mubr.msk.bf16.mxu1 %vm4401_vm1, %v4400_v18 }
 0x61b   : > { %v4834_v35 = vpop.f32.mrb[28].mxu0 }
 0x61c   : > { %v3966_v36 = vpop.f32.mrb[29].mxu0 }
 0x61d   : > { %v4836_v40 = vpop.f32.mrb[30].mxu0 }
 0x61e   : > { %v4146_v34 = vpack.i.bf16 %v4836_v40, %v4834_v35  ;;  %v3967_v42 = vpop.f32.mrb[31].mxu0 }
 0x656   : > { %v4840_v44 = vpop.f32.mrb[44].mxu1 }
 0x657   : > { %v3972_v46 = vpop.f32.mrb[45].mxu1 }
 0x658   : > { %v4842_v48 = vpop.f32.mrb[46].mxu1 }
 0x659   : > { %v4151_v53 = vpack.i.bf16 %v4842_v48, %v4840_v44  ;;  %v3973_v55 = vpop.f32.mrb[47].mxu1 }
 0x65b   : > { %v4846_v57 = vpop.f32.mrb[32].mxu0 }
 0x65c   : > { %v3978_v56 = vpop.f32.mrb[33].mxu0 }
 0x65d   : > { %v4848_v58 = vpop.f32.mrb[34].mxu0 }
 0x65e   : > { %v4166_v59 = vpack.i.bf16 %v4848_v58, %v4846_v57  ;;  %v3979_v52 = vpop.f32.mrb[35].mxu0 }
 0x663   : > { %v1892_v54 = vpop.f32.mrb[36].mxu0 }
 0x664   : > { %v1893_v0 = vadd.f32 %v3697_v62, %v1892_v54  ;;  %v3990_v1 = vpop.f32.mrb[37].mxu0 }
 0x665   : > { %v1895_v2 = vpop.f32.mrb[38].mxu0 }
 0x666   : > { %v1896_v3 = vadd.f32 %v3698_v63, %v1895_v2  ;;  %v3991_v6 = vpop.f32.mrb[39].mxu0  ;;  %v2052_v7 = vsel %vm1077_vm3, %v1893_v0, -inf }
 0x667   : > { %2053 = vmax.xlane.f32.xlu0 %v2052_v7 }
 0x668   : > { %v2055_v9 = vsel %vm1077_vm3, %v1896_v3, -inf }
 0x669   : > { %2056 = vmax.xlane.f32.xlu1 %v2055_v9 }
 0x68c   : > { %v1994_v12 = vpop.f32.mrb[40].mxu0 }
 0x68d   : > { %v4002_v13 = vpop.f32.mrb[41].mxu0  ;;  %v1995_v36 = vadd.f32 %v3697_v62, %v1994_v12 }
 0x68e   : > { %v1997_v15 = vpop.f32.mrb[42].mxu0 }
 0x68f   : > { %v1998_v16 = vadd.f32 %v3698_v63, %v1997_v15  ;;  %v4860_v19 = vpop.f32.mrb[48].mxu1  ;;  %v4003_v14 = vpop.f32.mrb[43].mxu0  ;;  %v2064_v2 = vsel %vm1077_vm3, %v1995_v36, -inf }
 0x690   : > { %v3984_v4 = vpop.f32.mrb[49].mxu1 }
 0x691   : > { %v4862_v17 = vpop.f32.mrb[50].mxu1  ;;  %v2067_v20 = vsel %vm1077_vm3, %v1998_v16, -inf }
 0x692   : > { %v4171_v23 = vpack.i.bf16 %v4862_v17, %v4860_v19  ;;  %2068 = vmax.xlane.f32.xlu1 %v2067_v20  ;;  %v3985_v24 = vpop.f32.mrb[51].mxu1 }
 0x697   : > { %v1943_v25 = vpop.f32.mrb[52].mxu1 }
 0x698   : > { %v1944_v27 = vadd.f32 %v3697_v62, %v1943_v25  ;;  %v3996_v30 = vpop.f32.mrb[53].mxu1 }
 0x699   : > { %v1946_v31 = vpop.f32.mrb[54].mxu1 }
 0x69a   : > { %v1947_v26 = vadd.f32 %v3698_v63, %v1946_v31  ;;  %v3997_v32 = vpop.f32.mrb[55].mxu1  ;;  %v2058_v33 = vsel %vm1077_vm3, %v1944_v27, -inf }
 0x69b   : > { %2059 = vmax.xlane.f32.xlu0 %v2058_v33 }
 0x69c   : > { %v2061_v42 = vsel %vm1077_vm3, %v1947_v26, -inf }
 0x69f   : > { %2062 = vmax.xlane.f32.xlu0 %v2061_v42  ;;  %v2045_v46 = vpop.f32.mrb[56].mxu1 }
 0x6a0   : > { %v2046_v55 = vadd.f32 %v3697_v62, %v2045_v46  ;;  %v4008_v56 = vpop.f32.mrb[57].mxu1 }
 0x6a1   : > { %v2048_v52 = vpop.f32.mrb[58].mxu1 }
 0x6a2   : > { %v4869_v54 = vadd.f32 %v3698_v63, %v2048_v52  ;;  %v4009_v1 = vpop.f32.mrb[59].mxu1  ;;  %v2070_v6 = vsel %vm1077_vm3, %v2046_v55, -inf }
 0x6a3   : > { %2191 = vrot.lane.b32.xlu1 %v4618_v10, %s4403_s20  ;;  %2065 = vmax.xlane.f32.xlu0 %v2064_v2 }
 0x6a4   : > { %v2073_v62 = vsel %vm1077_vm3, %v4869_v54, -inf }
 0x6a7   : > { %2238 = vrot.lane.b32.xlu1 %v4628_v22, %s4403_s20  ;;  %2071 = vmax.xlane.f32.xlu0 %v2070_v6 }
 0x6bd   : > { %2144 = vrot.lane.b32.xlu0 %v4620_v11, %s4403_s20 }
 0x6cb   : > { %2074 = vmax.xlane.f32.xlu1 %v2073_v62 }
 0x6dc   : > { %2285 = vrot.lane.b32.xlu1 %v4626_v21, %s4403_s20 }
 0x6f4   : > { %v2054_v63 = vpop.xlane.xlu0 %2053 }
 0x6f5   : > { %v2076_v7 = vsub.f32 %v1893_v0, %v2054_v63 }
 0x6f6   : > { %v2057_v9 = vpop.xlane.xlu1 %2056 }
 0x6f7   : > { %v2084_v12 = vmul.f32 1.442695, %v2076_v7  ;;  %v2077_v13 = vsub.f32 %v1896_v3, %v2057_v9 }
 0x6f9   : > { %4288 = vpow2.f32 %v2084_v12  ;;  %v2086_v15 = vmul.f32 1.442695, %v2077_v13 }
 0x6fb   : > { %4290 = vpow2.f32 %v2086_v15 }
 0x703   : > { %v4883_v14 = vpop.eup %4288 }
 0x704   : > { %v2100_v4 = vsel %vm1077_vm3, %v4883_v14, 0.0 }
 0x705   : > { %v4887_v20 = vpop.eup %4290  ;;  %2101 = vadd.xlane.f32.xlu0 %v2100_v4 }
 0x706   : > { %v2103_v24 = vsel %vm1077_vm3, %v4887_v20, 0.0 }
 0x707   : > { %2104 = vadd.xlane.f32.xlu1 %v2103_v24 }
 0x71f   : > { %v2069_v25 = vpop.xlane.xlu1 %2068 }
 0x720   : > { %v2081_v31 = vsub.f32 %v1998_v16, %v2069_v25 }
 0x722   : > { %v2094_v46 = vmul.f32 1.442695, %v2081_v31 }
 0x723   : > { %v2192_v0 = vpop.permute.xlu1 %2191 }
 0x724   : > { %4017 = vmatpush3.bf16.msra.mxu1 %v2192_v0 }
 0x725   : > { %4028 = vmatprep.subr.bf16.mxu1 %v4400_v18 }
 0x727   : > { %v2239_v24 = vpop.permute.xlu1 %2238 }
 0x728   : > { %v2060_v3 = vpop.xlane.xlu0 %2059 }
 0x729   : > { %v2078_v30 = vsub.f32 %v1944_v27, %v2060_v3 }
 0x72b   : > { %v2088_v32 = vmul.f32 1.442695, %v2078_v30 }
 0x72c   : > { %v2063_v33 = vpop.xlane.xlu0 %2062 }
 0x72d   : > { %4292 = vpow2.f32 %v2088_v32  ;;  %v2079_v42 = vsub.f32 %v1947_v26, %v2063_v33 }
 0x72f   : > { %v2090_v56 = vmul.f32 1.442695, %v2079_v42 }
 0x730   : > { %v2066_v52 = vpop.xlane.xlu0 %2065 }
 0x731   : > { %4294 = vpow2.f32 %v2090_v56  ;;  %v2080_v1 = vsub.f32 %v1995_v36, %v2066_v52 }
 0x732   : > { %4296 = vpow2.f32 %v2094_v46 }
 0x733   : > { %v2092_v2 = vmul.f32 1.442695, %v2080_v1 }
 0x734   : > { %v2072_v6 = vpop.xlane.xlu0 %2071 }
 0x735   : > { %4298 = vpow2.f32 %v2092_v2  ;;  %v2082_v62 = vsub.f32 %v2046_v55, %v2072_v6 }
 0x737   : > { %v4293_v63 = vpop.eup %4292  ;;  %v2096_v7 = vmul.f32 1.442695, %v2082_v62 }
 0x738   : > { %v2145_v9 = vpop.permute.xlu0 %2144  ;;  %v2106_v27 = vsel %vm1077_vm3, %v4293_v63, 0.0 }
 0x739   : > { %4300 = vpow2.f32 %v2096_v7  ;;  %2107 = vadd.xlane.f32.xlu0 %v2106_v27  ;;  %4011 = vmatpush3.bf16.msra.mxu0 %v2145_v9 }
 0x73a   : > { %4022 = vmatprep.subr.bf16.mxu0 %v4400_v18 }
 0x73b   : > { %v4295_v16 = vpop.eup %4294 }
 0x73c   : > { %v2109_v26 = vsel %vm1077_vm3, %v4295_v16, 0.0  ;;  %v4297_v12 = vpop.eup %4296 }
 0x73d   : > { %2110 = vadd.xlane.f32.xlu1 %v2109_v26  ;;  %v2115_v55 = vsel %vm1077_vm3, %v4297_v12, 0.0 }
 0x73f   : > { %v4299_v36 = vpop.eup %4298 }
 0x740   : > { %v2112_v13 = vsel %vm1077_vm3, %v4299_v36, 0.0 }
 0x741   : > { %2113 = vadd.xlane.f32.xlu0 %v2112_v13  ;;  %2116 = vadd.xlane.f32.xlu1 %v2115_v55 }
 0x743   : > { %v4897_v15 = vpop.eup %4300 }
 0x744   : > { %v2118_v4 = vsel %vm1077_vm3, %v4897_v15, 0.0 }
 0x745   : > { %2119 = vadd.xlane.f32.xlu0 %v2118_v4 }
 0x752   : > { %2388 = vrot.lane.b32.xlu1 %v4579_v49, %s4404_s26 }
 0x758   : > { %v2075_v25 = vpop.xlane.xlu1 %2074 }
 0x759   : > { %v2083_v0 = vsub.f32 %v4869_v54, %v2075_v25 }
 0x75b   : > { %2337 = vrot.lane.b32.xlu0 %v4581_v50, %s4404_s26  ;;  %v2098_v3 = vmul.f32 1.442695, %v2083_v0 }
 0x75d   : > { %4302 = vpow2.f32 %v2098_v3 }
 0x75f   : > { %2335 = vrot.lane.b32.xlu0 %v4570_v29, %s4404_s26 }
 0x763   : > { %2386 = vrot.lane.b32.xlu0 %v4568_v28, %s4404_s26  ;;  %v2286_v28 = vpop.permute.xlu1 %2285 }
 0x767   : > { %2437 = vrot.lane.b32.xlu0 %v4574_v39, %s4404_s26  ;;  %v4912_v30 = vpop.eup %4302 }
 0x768   : > { %v2121_v49 = vsel %vm1077_vm3, %v4912_v30, 0.0 }
 0x776   : > { %2122 = vadd.xlane.f32.xlu1 %v2121_v49 }
 0x787   : > { %2439 = vrot.lane.b32.xlu1 %v4588_v61, %s4404_s26 }
 0x78b   : > { %2490 = vrot.lane.b32.xlu1 %v4586_v60, %s4404_s26 }
 0x78f   : > { %2488 = vrot.lane.b32.xlu1 %v4572_v38, %s4404_s26 }
 0x792   : > { %v2102_v29 = vpop.xlane.xlu0 %2101 }
 0x793   : > { %4304 = vrcp.f32 %v2102_v29 }
 0x794   : > { %v2105_v39 = vpop.xlane.xlu1 %2104 }
 0x795   : > { %4306 = vrcp.f32 %v2105_v39 }
 0x79d   : > { %v4305_v50 = vpop.eup %4304 }
 0x79e   : > { %v2132_v31 = vmul.f32 %v4305_v50, %v4883_v14 }
 0x79f   : > { %v4307_v54 = vpop.eup %4306 }
 0x7a0   : > { %v2133_v32 = vmul.f32 %v4307_v54, %v4887_v20 }
 0x7a2   : > { %v2140_v33 = vpack.c.bf16 %v2133_v32, %v2132_v31 }
 0x7a4   : > { %4013 = vmatmul.mubr.msk.bf16.vlgmr.msra.gmra.mrb[44].mxu0 %vm1077_vm3, %v2140_v33 }
 0x7a5   : > { %4023 = vmatpush3.bf16.msra.mxu0 %v2239_v24  ;;  %4024 = vmatprep.mubr.msk.bf16.mxu0 %vm4401_vm1, %v4400_v18 }
 0x7a6   : > { %4034 = vmatprep.subr.bf16.mxu0 %v4400_v18 }
 0x7c6   : > { %v2108_v38 = vpop.xlane.xlu0 %2107 }
 0x7c7   : > { %4308 = vrcp.f32 %v2108_v38 }
 0x7ca   : > { %v2111_v60 = vpop.xlane.xlu1 %2110 }
 0x7cb   : > { %4310 = vrcp.f32 %v2111_v60 }
 0x7ce   : > { %v2114_v61 = vpop.xlane.xlu0 %2113  ;;  %v2117_v42 = vpop.xlane.xlu1 %2116 }
 0x7cf   : > { %4312 = vrcp.f32 %v2114_v61 }
 0x7d0   : > { %4314 = vrcp.f32 %v2117_v42 }
 0x7d1   : > { %v4309_v14 = vpop.eup %4308 }
 0x7d2   : > { %v2134_v20 = vmul.f32 %v4309_v14, %v4293_v63  ;;  %v2120_v52 = vpop.xlane.xlu0 %2119 }
 0x7d3   : > { %4316 = vrcp.f32 %v2120_v52 }
 0x7d5   : > { %v4311_v46 = vpop.eup %4310 }
 0x7d6   : > { %v2135_v56 = vmul.f32 %v4311_v46, %v4295_v16  ;;  %v2338_v9 = vpop.permute.xlu0 %2337  ;;  %v2389_v16 = vpop.permute.xlu1 %2388 }
 0x7d7   : > { %v2343_v26 = vsel %vm888_vm2, %v2338_v9, 0 }
 0x7d8   : > { %v2141_v1 = vpack.c.bf16 %v2135_v56, %v2134_v20 }
 0x7d9   : > { %v4313_v2 = vpop.eup %4312 }
 0x7da   : > { %v4315_v6 = vpop.eup %4314  ;;  %v2136_v62 = vmul.f32 %v4313_v2, %v4299_v36  ;;  %4019 = vmatmul.mubr.msk.bf16.vlgmr.msra.gmra.mrb[60].mxu1 %vm1077_vm3, %v2141_v1  ;;  %v2336_v63 = vpop.permute.xlu0 %2335  ;;  %v3707_v1 = vld [vmem:[%s5350_s9 + $0x30] sm:$0xff] }
 0x7db   : > { %v2137_v7 = vmul.f32 %v4315_v6, %v4297_v12  ;;  %4029 = vmatpush3.bf16.msra.mxu1 %v2286_v28  ;;  %4030 = vmatprep.mubr.msk.bf16.mxu1 %vm4401_vm1, %v4400_v18  ;;  %v2394_v28 = vsel %vm888_vm2, %v2389_v16, 0  ;;  %v3708_v6 = vld [vmem:[%s5350_s9 + $0x38] sm:$0xff] }
 0x7dc   : > { %4040 = vmatprep.subr.bf16.mxu1 %v4400_v18 }
 0x7dd   : > { %v2142_v27 = vpack.c.bf16 %v2137_v7, %v2136_v62  ;;  %v4317_v4 = vpop.eup %4316 }
 0x7de   : > { %v2387_v55 = vpop.permute.xlu0 %2386  ;;  %v2138_v25 = vmul.f32 %v4317_v4, %v4897_v15 }
 0x7df   : > { %4025 = vmatmul.mubr.msk.bf16.vlgmr.msra.gmra.mrb[48].mxu0 %vm1077_vm3, %v2142_v27 }
 0x7e0   : > { %4035 = vmatpush3.bf16.xpose.msra.mxu0 %v2343_v26  ;;  %4036 = vmatprep.mubr.msk.bf16.mxu0 %vm4401_vm1, %v4400_v18 }
 0x7e1   : > { %4046 = vmatprep.subr.bf16.mxu0 %v4400_v18 }
 0x7e2   : > { %v2438_v0 = vpop.permute.xlu0 %2437 }
 0x7e7   : > { %4037 = vmatmul.mubr.msk.bf16.vlgmr.msra.gmra.mrb[52].mxu0 %vm888_vm2, %v2336_v63 }
 0x7e8   : > { %4048 = vmatprep.mubr.msk.bf16.mxu0 %vm4401_vm1, %v4400_v18 }
 0x803   : > { %v2123_v12 = vpop.xlane.xlu1 %2122 }
 0x804   : > { %4318 = vrcp.f32 %v2123_v12 }
 0x807   : > { %v2440_v36 = vpop.permute.xlu1 %2439 }
 0x808   : > { %v2445_v13 = vsel %vm888_vm2, %v2440_v36, 0 }
 0x809   : > { %4047 = vmatpush3.bf16.xpose.msra.mxu0 %v2445_v13 }
 0x80a   : > { %4058 = vmatprep.subr.bf16.mxu0 %v4400_v18 }
 0x80b   : > { %v2491_v15 = vpop.permute.xlu1 %2490 }
 0x80c   : > { %v2496_v29 = vsel %vm888_vm2, %v2491_v15, 0 }
 0x80e   : > { %v4319_v24 = vpop.eup %4318 }
 0x80f   : > { %v2139_v3 = vmul.f32 %v4319_v24, %v4912_v30  ;;  %v2489_v30 = vpop.permute.xlu1 %2488 }
 0x810   : > { %4049 = vmatmul.mubr.msk.bf16.vlgmr.msra.gmra.mrb[56].mxu0 %vm888_vm2, %v2438_v0 }
 0x811   : > { %v2143_v49 = vpack.c.bf16 %v2139_v3, %v2138_v25  ;;  %4060 = vmatprep.mubr.msk.bf16.mxu0 %vm4401_vm1, %v4400_v18 }
 0x813   : > { %4031 = vmatmul.mubr.msk.bf16.vlgmr.msra.gmra.mrb[64].mxu1 %vm1077_vm3, %v2143_v49 }
 0x814   : > { %4041 = vmatpush3.bf16.xpose.msra.mxu1 %v2394_v28  ;;  %4042 = vmatprep.mubr.msk.bf16.mxu1 %vm4401_vm1, %v4400_v18 }
 0x815   : > { %4052 = vmatprep.subr.bf16.mxu1 %v4400_v18 }
 0x81b   : > { %4043 = vmatmul.mubr.msk.bf16.vlgmr.msra.gmra.mrb[68].mxu1 %vm888_vm2, %v2387_v55 }
 0x81c   : > { %4053 = vmatpush3.bf16.xpose.msra.mxu1 %v2496_v29  ;;  %4054 = vmatprep.mubr.msk.bf16.mxu1 %vm4401_vm1, %v4400_v18 }
 0x81d   : > { %4064 = vmatprep.subr.bf16.mxu1 %v4400_v18 }
 0x823   : > { %4055 = vmatmul.mubr.msk.bf16.vlgmr.msra.gmra.mrb[72].mxu1 %vm888_vm2, %v2489_v30 }
 0x824   : > { %4066 = vmatprep.mubr.msk.bf16.mxu1 %vm4401_vm1, %v4400_v18 }
 0x877   : > { %v4960_v39 = vpop.f32.mrb[44].mxu0 }
 0x878   : > { %v4014_v50 = vpop.f32.mrb[45].mxu0 }
 0x879   : > { %v4962_v54 = vpop.f32.mrb[46].mxu0 }
 0x87a   : > { %v4156_v31 = vpack.i.bf16 %v4962_v54, %v4960_v39  ;;  %v4015_v32 = vpop.f32.mrb[47].mxu0 }
 0x8ad   : > { %v4966_v33 = vpop.f32.mrb[60].mxu1 }
 0x8ae   : > { %v4020_v38 = vpop.f32.mrb[61].mxu1 }
 0x8af   : > { %v4968_v60 = vpop.f32.mrb[62].mxu1 }
 0x8b0   : > { %v4161_v61 = vpack.i.bf16 %v4968_v60, %v4966_v33  ;;  %v4021_v42 = vpop.f32.mrb[63].mxu1 }
 0x8b2   : > { %v4972_v14 = vpop.f32.mrb[48].mxu0 }
 0x8b3   : > { %v4026_v46 = vpop.f32.mrb[49].mxu0 }
 0x8b4   : > { %v4974_v20 = vpop.f32.mrb[50].mxu0 }
 0x8b5   : > { %v4181_v56 = vpack.i.bf16 %v4974_v20, %v4972_v14  ;;  %v4027_v52 = vpop.f32.mrb[51].mxu0 }
 0x8ba   : > { %v2379_v2 = vpop.f32.mrb[52].mxu0 }
 0x8bb   : > { %v2380_v62 = vadd.f32 %v3707_v1, %v2379_v2  ;;  %v4038_v7 = vpop.f32.mrb[53].mxu0 }
 0x8bc   : > { %v2382_v9 = vpop.f32.mrb[54].mxu0 }
 0x8bd   : > { %v2383_v27 = vadd.f32 %v3708_v6, %v2382_v9  ;;  %v4039_v26 = vpop.f32.mrb[55].mxu0  ;;  %v2539_v63 = vsel %vm1077_vm3, %v2380_v62, -inf }
 0x8be   : > { %2540 = vmax.xlane.f32.xlu0 %v2539_v63 }
 0x8bf   : > { %v2542_v16 = vsel %vm1077_vm3, %v2383_v27, -inf }
 0x8c0   : > { %2543 = vmax.xlane.f32.xlu1 %v2542_v16 }
 0x8e3   : > { %v2481_v12 = vpop.f32.mrb[56].mxu0 }
 0x8e4   : > { %v4050_v36 = vpop.f32.mrb[57].mxu0  ;;  %v2482_v46 = vadd.f32 %v3707_v1, %v2481_v12 }
 0x8e5   : > { %v2484_v13 = vpop.f32.mrb[58].mxu0 }
 0x8e6   : > { %v2485_v55 = vadd.f32 %v3708_v6, %v2484_v13  ;;  %v4986_v4 = vpop.f32.mrb[64].mxu1  ;;  %v4051_v24 = vpop.f32.mrb[59].mxu0  ;;  %v2551_v36 = vsel %vm1077_vm3, %v2482_v46, -inf }
 0x8e7   : > { %v4032_v25 = vpop.f32.mrb[65].mxu1 }
 0x8e8   : > { %v4988_v0 = vpop.f32.mrb[66].mxu1  ;;  %v2554_v3 = vsel %vm1077_vm3, %v2485_v55, -inf }
 0x8e9   : > { %v4191_v49 = vpack.i.bf16 %v4988_v0, %v4986_v4  ;;  %2555 = vmax.xlane.f32.xlu1 %v2554_v3  ;;  %v4033_v28 = vpop.f32.mrb[67].mxu1 }
 0x8ee   : > { %v2430_v15 = vpop.f32.mrb[68].mxu1 }
 0x8ef   : > { %v2431_v29 = vadd.f32 %v3707_v1, %v2430_v15  ;;  %v4044_v30 = vpop.f32.mrb[69].mxu1 }
 0x8f0   : > { %v2433_v50 = vpop.f32.mrb[70].mxu1 }
 0x8f1   : > { %v2434_v32 = vadd.f32 %v3708_v6, %v2433_v50  ;;  %v4045_v38 = vpop.f32.mrb[71].mxu1  ;;  %v2545_v42 = vsel %vm1077_vm3, %v2431_v29, -inf }
 0x8f2   : > { %2546 = vmax.xlane.f32.xlu0 %v2545_v42 }
 0x8f3   : > { %v2548_v52 = vsel %vm1077_vm3, %v2434_v32, -inf }
 0x8f6   : > { %2549 = vmax.xlane.f32.xlu0 %v2548_v52  ;;  %v2532_v2 = vpop.f32.mrb[72].mxu1 }
 0x8f7   : > { %v2533_v7 = vadd.f32 %v3707_v1, %v2532_v2  ;;  %v4056_v9 = vpop.f32.mrb[73].mxu1 }
 0x8f8   : > { %v2535_v26 = vpop.f32.mrb[74].mxu1 }
 0x8f9   : > { %v4995_v63 = vadd.f32 %v3708_v6, %v2535_v26  ;;  %v4057_v16 = vpop.f32.mrb[75].mxu1  ;;  %v2557_v24 = vsel %vm1077_vm3, %v2533_v7, -inf }
 0x8fa   : > { %2552 = vmax.xlane.f32.xlu0 %v2551_v36 }
 0x8fb   : > { %v2560_v13 = vsel %vm1077_vm3, %v4995_v63, -inf }
 0x8fc   : > { %2561 = vmax.xlane.f32.xlu1 %v2560_v13 }
 0x8fe   : > { %2558 = vmax.xlane.f32.xlu0 %v2557_v24 }
 0x94b   : > { %v2541_v12 = vpop.xlane.xlu0 %2540 }
 0x94c   : > { %v2563_v25 = vsub.f32 %v2380_v62, %v2541_v12 }
 0x94d   : > { %v2544_v3 = vpop.xlane.xlu1 %2543 }
 0x94e   : > { %v2571_v28 = vmul.f32 1.442695, %v2563_v25  ;;  %v2564_v1 = vsub.f32 %v2383_v27, %v2544_v3 }
 0x950   : > { %4320 = vpow2.f32 %v2571_v28  ;;  %v2573_v15 = vmul.f32 1.442695, %v2564_v1 }
 0x952   : > { %4322 = vpow2.f32 %v2573_v15 }
 0x95a   : > { %v5001_v6 = vpop.eup %4320 }
 0x95b   : > { %v2587_v30 = vsel %vm1077_vm3, %v5001_v6, 0.0 }
 0x95c   : > { %v5005_v50 = vpop.eup %4322  ;;  %2588 = vadd.xlane.f32.xlu0 %v2587_v30 }
 0x95d   : > { %v2590_v38 = vsel %vm1077_vm3, %v5005_v50, 0.0 }
 0x95e   : > { %2591 = vadd.xlane.f32.xlu1 %v2590_v38 }
 0x976   : > { %v2556_v42 = vpop.xlane.xlu1 %2555 }
 0x977   : > { %v2568_v2 = vsub.f32 %v2485_v55, %v2556_v42 }
 0x979   : > { %v2581_v16 = vmul.f32 1.442695, %v2568_v2 }
 0x97f   : > { %v2547_v62 = vpop.xlane.xlu0 %2546 }
 0x980   : > { %v2565_v52 = vsub.f32 %v2431_v29, %v2547_v62 }
 0x982   : > { %v2575_v27 = vmul.f32 1.442695, %v2565_v52 }
 0x983   : > { %v2550_v9 = vpop.xlane.xlu0 %2549 }
 0x984   : > { %4324 = vpow2.f32 %v2575_v27  ;;  %v2566_v26 = vsub.f32 %v2434_v32, %v2550_v9 }
 0x986   : > { %v2577_v36 = vmul.f32 1.442695, %v2566_v26 }
 0x987   : > { %v2553_v13 = vpop.xlane.xlu0 %2552 }
 0x988   : > { %4326 = vpow2.f32 %v2577_v36  ;;  %v2567_v24 = vsub.f32 %v2482_v46, %v2553_v13 }
 0x989   : > { %4328 = vpow2.f32 %v2581_v16  ;;  %v2562_v62 = vpop.xlane.xlu1 %2561 }
 0x98a   : > { %v2579_v12 = vmul.f32 1.442695, %v2567_v24 }
 0x98b   : > { %v2559_v25 = vpop.xlane.xlu0 %2558 }
 0x98c   : > { %4330 = vpow2.f32 %v2579_v12  ;;  %v2569_v3 = vsub.f32 %v2533_v7, %v2559_v25 }
 0x98e   : > { %v4325_v28 = vpop.eup %4324  ;;  %v2583_v1 = vmul.f32 1.442695, %v2569_v3  ;;  %v4213_v3 = vld [vmem:[%s5345_s4 + $0x8] sm:$0xff]  }
 0x98f   : > { %v2593_v15 = vsel %vm1077_vm3, %v4325_v28, 0.0 }
 0x990   : > { %4332 = vpow2.f32 %v2583_v1  ;;  %2594 = vadd.xlane.f32.xlu0 %v2593_v15 }
 0x992   : > { %v4327_v55 = vpop.eup %4326 }
 0x993   : > { %v2596_v29 = vsel %vm1077_vm3, %v4327_v55, 0.0  ;;  %v5011_v32 = vpop.eup %4328 }
 0x994   : > { %2597 = vadd.xlane.f32.xlu1 %v2596_v29  ;;  %v2602_v7 = vsel %vm1077_vm3, %v5011_v32, 0.0 }
 0x996   : > { %v5013_v30 = vpop.eup %4330 }
 0x997   : > { %v2599_v46 = vsel %vm1077_vm3, %v5013_v30, 0.0 }
 0x998   : > { %2600 = vadd.xlane.f32.xlu0 %v2599_v46  ;;  %2603 = vadd.xlane.f32.xlu1 %v2602_v7 }
 0x99a   : > { %v5019_v38 = vpop.eup %4332 }
 0x99b   : > { %v2605_v42 = vsel %vm1077_vm3, %v5019_v38, 0.0 }
 0x99c   : > { %2606 = vadd.xlane.f32.xlu0 %v2605_v42 }
 0x9a9   : > { %2678 = vrot.lane.b32.xlu1 %v4618_v10, %s4404_s26  ;;  %v2570_v10 = vsub.f32 %v4995_v63, %v2562_v62 }
 0x9ad   : > { %2725 = vrot.lane.b32.xlu1 %v4628_v22, %s4404_s26  ;;  %v2585_v22 = vmul.f32 1.442695, %v2570_v10 }
 0x9af   : > { %4334 = vpow2.f32 %v2585_v22 }
 0x9b2   : > { %2631 = vrot.lane.b32.xlu0 %v4620_v11, %s4404_s26 }
 0x9b6   : > { %4147 = vrot.lane.b32.xlu0 %v4146_v34, %s4405_s21 }
 0x9b9   : > { %v4335_v11 = vpop.eup %4334 }
 0x9ba   : > { %4157 = vrot.lane.b32.xlu0 %v4156_v31, %s4406_s22  ;;  %v2608_v52 = vsel %vm1077_vm3, %v4335_v11, 0.0 }
 0x9be   : > { %4167 = vrot.lane.b32.xlu0 %v4166_v59, %s4405_s21 }
 0x9d1   : > { %2609 = vadd.xlane.f32.xlu1 %v2608_v52 }
 0x9e2   : > { %2772 = vrot.lane.b32.xlu1 %v4626_v21, %s4404_s26 }
 0x9e6   : > { %4152 = vrot.lane.b32.xlu1 %v4151_v53, %s4405_s21 }
 0x9e9   : > { %v2589_v35 = vpop.xlane.xlu0 %2588 }
 0x9ea   : > { %4162 = vrot.lane.b32.xlu1 %v4161_v61, %s4406_s22 }
 0x9eb   : > { %v2592_v40 = vpop.xlane.xlu1 %2591 }
 0x9ec   : > { %4336 = vrcp.f32 %v2592_v40 }
 0x9ed   : > { %4338 = vrcp.f32 %v2589_v35 }
 0x9ee   : > { %4172 = vrot.lane.b32.xlu1 %v4171_v23, %s4405_s21 }
 0x9f6   : > { %v4337_v48 = vpop.eup %4336 }
 0x9f7   : > { %v4339_v53 = vpop.eup %4338  ;;  %v2620_v19 = vmul.f32 %v4337_v48, %v5005_v50 }
 0x9f8   : > { %v2619_v23 = vmul.f32 %v4339_v53, %v5001_v6 }
 0x9fa   : > { %v2627_v60 = vpack.c.bf16 %v2620_v19, %v2619_v23 }
 0xa1d   : > { %v2595_v34 = vpop.xlane.xlu0 %2594 }
 0xa1e   : > { %4340 = vrcp.f32 %v2595_v34 }
 0xa21   : > { %v2598_v21 = vpop.xlane.xlu1 %2597 }
 0xa22   : > { %4342 = vrcp.f32 %v2598_v21 }
 0xa25   : > { %v2601_v57 = vpop.xlane.xlu0 %2600  ;;  %v2604_v44 = vpop.xlane.xlu1 %2603 }
 0xa26   : > { %4344 = vrcp.f32 %v2601_v57 }
 0xa27   : > { %4346 = vrcp.f32 %v2604_v44 }
 0xa28   : > { %v4341_v39 = vpop.eup %4340 }
 0xa29   : > { %v2607_v58 = vpop.xlane.xlu0 %2606  ;;  %v2679_v59 = vpop.permute.xlu1 %2678  ;;  %v2621_v54 = vmul.f32 %v4341_v39, %v4325_v28 }
 0xa2a   : > { %4065 = vmatpush3.bf16.msra.mxu1 %v2679_v59  ;;  %4348 = vrcp.f32 %v2607_v58 }
 0xa2b   : > { %4076 = vmatprep.subr.bf16.mxu1 %v4400_v18 }
 0xa2c   : > { %v4343_v17 = vpop.eup %4342 }
 0xa2d   : > { %v2622_v31 = vmul.f32 %v4343_v17, %v4327_v55  ;;  %v2632_v33 = vpop.permute.xlu0 %2631  ;;  %v2726_v27 = vpop.permute.xlu1 %2725 }
 0xa2e   : > { %4059 = vmatpush3.bf16.msra.mxu0 %v2632_v33 }
 0xa2f   : > { %4070 = vmatprep.subr.bf16.mxu0 %v4400_v18  ;;  %v2628_v61 = vpack.c.bf16 %v2622_v31, %v2621_v54 }
 0xa30   : > { %v4345_v63 = vpop.eup %4344 }
 0xa31   : > { %v4347_v2 = vpop.eup %4346  ;;  %4061 = vmatmul.mubr.msk.bf16.vlgmr.msra.gmra.mrb[60].mxu0 %vm1077_vm3, %v2627_v60  ;;  %4067 = vmatmul.mubr.msk.bf16.vlgmr.msra.gmra.mrb[76].mxu1 %vm1077_vm3, %v2628_v61  ;;  %v2623_v6 = vmul.f32 %v4345_v63, %v5013_v30  ;;  %v4148_v57 = vpop.permute.xlu0 %4147 }
 0xa32   : > { %4071 = vmatpush3.bf16.msra.mxu0 %v2726_v27  ;;  %4072 = vmatprep.mubr.msk.bf16.mxu0 %vm4401_vm1, %v4400_v18  ;;  %v2624_v50 = vmul.f32 %v4347_v2, %v5011_v32  ;;  %v4149_v48 = vunpack.i.l.bf16 %v4148_v57 }
 0xa33   : > { %4078 = vmatprep.mubr.msk.bf16.mxu1 %vm4401_vm1, %v4400_v18  ;;  %v4212_v18 = vld [vmem:[%s5345_s4] sm:$0xff]  }
 0xa34   : > { %v2629_v9 = vpack.c.bf16 %v2624_v50, %v2623_v6  ;;  %v4349_v36 = vpop.eup %4348  ;;  %4082 = vmatprep.subr.bf16.mxu0 %v4212_v18  ;;  %v2915_v23 = vsel %vm888_vm2, %v4716_v37, %v4149_v48 }
 0xa35   : > { %v2625_v24 = vmul.f32 %v4349_v36, %v5019_v38  ;;  %v4158_v14 = vpop.permute.xlu0 %4157 }
 0xa36   : > { %v4159_v59 = vunpack.i.l.bf16 %v4158_v14 }
 0xa38   : > { %v2923_v6 = vsel %vm1077_vm3, %v2915_v23, %v4159_v59 }
 0xa39   : > { %4073 = vmatmul.mubr.msk.bf16.vlgmr.msra.gmra.mrb[64].mxu0 %vm1077_vm3, %v2629_v9  ;;  %v4168_v53 = vpop.permute.xlu0 %4167 }
 0xa3a   : > { %4083 = vmatpush3.bf16.msra.mxu0 %v4212_v18 }
 0xa3b   : > { %4084 = vmatprep.subr.bf16.mxu0 %v4213_v3 }
 0xa3e   : > { %4085 = vmatpush3.bf16.msra.mxu0 %v4213_v3 }
 0xa5e   : > { %v2610_v26 = vpop.xlane.xlu1 %2609 }
 0xa5f   : > { %4350 = vrcp.f32 %v2610_v26 }
 0xa62   : > { %v2773_v16 = vpop.permute.xlu1 %2772 }
 0xa63   : > { %4077 = vmatpush3.bf16.msra.mxu1 %v2773_v16 }
 0xa66   : > { %v4153_v44 = vpop.permute.xlu1 %4152 }
 0xa67   : > { %v4155_v58 = vunpack.i.h.bf16 %v4153_v44  ;;  %v4154_v4 = vunpack.i.l.bf16 %v4153_v44 }
 0xa69   : > { %v4351_v13 = vpop.eup %4350  ;;  %v2918_v54 = vsel %vm888_vm2, %v4722_v45, %v4155_v58  ;;  %v2917_v31 = vsel %vm888_vm2, %v4720_v43, %v4154_v4  ;;  %v4384_v58 = vld [vmem:[%s4528_s28] sm:$0xff] }
 0xa6a   : > { %v2626_v12 = vmul.f32 %v4351_v13, %v4335_v11  ;;  %v4163_v20 = vpop.permute.xlu1 %4162 }
 0xa6b   : > { %v4165_v39 = vunpack.i.h.bf16 %v4163_v20  ;;  %v4164_v19 = vunpack.i.l.bf16 %v4163_v20 }
 0xa6c   : > { %v2630_v25 = vpack.c.bf16 %v2626_v12, %v2625_v24  ;;  %v4170_v24 = vunpack.i.h.bf16 %v4168_v53  ;;  %v4169_v12 = vunpack.i.l.bf16 %v4168_v53 }
 0xa6d   : > { %v2925_v50 = vsel %vm1077_vm3, %v2917_v31, %v4164_v19  ;;  %v2926_v37 = vsel %vm1077_vm3, %v2918_v54, %v4165_v39  ;;  %v4386_v19 = vld [vmem:[%s4528_s28 + $0x8] sm:$0xff]  ;;  %v4387_v31 = vld [vmem:[%s4528_s28 + $0x18] sm:$0xff] }
 0xa6e   : > { %4079 = vmatmul.mubr.msk.bf16.vlgmr.msra.gmra.mrb[80].mxu1 %vm1077_vm3, %v2630_v25  ;;  %v4173_v0 = vpop.permute.xlu1 %4172 }
 0xb04   : > { %v2671_v28 = vpop.f32.mrb[60].mxu0  ;;  %v2718_v1 = vpop.f32.mrb[76].mxu1 }
 0xb05   : > { %v4062_v15 = vpop.f32.mrb[61].mxu0  ;;  %v4068_v55 = vpop.f32.mrb[77].mxu1 }
 0xb06   : > { %v2674_v29 = vpop.f32.mrb[62].mxu0  ;;  %v2721_v32 = vpop.f32.mrb[78].mxu1 }
 0xb07   : > { %v4176_v30 = vpack.i.bf16 %v2674_v29, %v2671_v28  ;;  %v4186_v46 = vpack.i.bf16 %v2721_v32, %v2718_v1  ;;  %v4063_v7 = vpop.f32.mrb[63].mxu0  ;;  %v4069_v38 = vpop.f32.mrb[79].mxu1  ;;  %v2920_v28 = vsel %vm888_vm2, %v4726_v51, %v4170_v24  ;;  %v2919_v1 = vsel %vm888_vm2, %v4724_v47, %v4169_v12  ;;  %v4391_v12 = vld [vmem:[%s4528_s28 + $0x38] sm:$0xff] }
 0xb09   : > { %4177 = vrot.lane.b32.xlu0 %v4176_v30, %s4407_s30  ;;  %4187 = vrot.lane.b32.xlu1 %v4186_v46, %s4407_s30 }
 0xb0c   : > { %v2765_v42 = vpop.f32.mrb[64].mxu0 }
 0xb0d   : > { %4182 = vrot.lane.b32.xlu0 %v4181_v56, %s4406_s22  ;;  %v4074_v62 = vpop.f32.mrb[65].mxu0  ;;  %4192 = vrot.lane.b32.xlu1 %v4191_v49, %s4406_s22  ;;  %v4150_v56 = vunpack.i.h.bf16 %v4148_v57  ;;  %v4160_v49 = vunpack.i.h.bf16 %v4158_v14 }
 0xb0e   : > { %v2768_v10 = vpop.f32.mrb[66].mxu0  ;;  %v4174_v62 = vunpack.i.l.bf16 %v4173_v0 }
 0xb0f   : > { %v4196_v22 = vpack.i.bf16 %v2768_v10, %v2765_v42  ;;  %v4075_v11 = vpop.f32.mrb[67].mxu0  ;;  %v2916_v17 = vsel %vm888_vm2, %v4718_v41, %v4150_v56  ;;  %v4175_v42 = vunpack.i.h.bf16 %v4173_v0 }
 0xb10   : > { %v2924_v41 = vsel %vm1077_vm3, %v2916_v17, %v4160_v49  ;;  %v2921_v11 = vsel %vm888_vm2, %v4736_v5, %v4174_v62  ;;  %v3717_v5 = vld [vmem:[%s5349_s8] ss:$0 sm:$0xff]  ;;  %v4385_v49 = vld [vmem:[%s4528_s28 + $0x10] sm:$0xff] }
 0xb11   : > { %4197 = vrot.lane.b32.xlu0 %v4196_v22, %s4407_s30  ;;  %v2922_v47 = vsel %vm888_vm2, %v4738_v8, %v4175_v42 }
 0xb41   : > { %v2812_v52 = vpop.f32.mrb[80].mxu1 }
 0xb42   : > { %v4080_v35 = vpop.f32.mrb[81].mxu1 }
 0xb43   : > { %v2815_v40 = vpop.f32.mrb[82].mxu1 }
 0xb44   : > { %v4201_v34 = vpack.i.bf16 %v2815_v40, %v2812_v52  ;;  %v4081_v21 = vpop.f32.mrb[83].mxu1 }
 0xb46   : > { %4202 = vrot.lane.b32.xlu1 %v4201_v34, %s4407_s30 }
 0xb7b   : > { %v4178_v33 = vpop.permute.xlu0 %4177  ;;  %v4188_v60 = vpop.permute.xlu1 %4187 }
 0xb7c   : > { %v4180_v61 = vunpack.i.h.bf16 %v4178_v33  ;;  %v4179_v63 = vunpack.i.l.bf16 %v4178_v33  ;;  %v4190_v2 = vunpack.i.h.bf16 %v4188_v60  ;;  %v4189_v27 = vunpack.i.l.bf16 %v4188_v60 }
 0xb7e   : > { %v2933_v45 = vsel %vm2931_vm4, %v2924_v41, %v4180_v61  ;;  %v2932_v9 = vsel %vm2931_vm4, %v2923_v6, %v4179_v63  ;;  %v2935_v43 = vsel %vm2931_vm4, %v2926_v37, %v4190_v2  ;;  %v2934_v26 = vsel %vm2931_vm4, %v2925_v50, %v4189_v27 }
 0xb7f   : > { %v2940_v16 = vpack.c.bf16 %v2933_v45, %v2932_v9  ;;  %v2941_v36 = vpack.c.bf16 %v2935_v43, %v2934_v26  ;;  %v4183_v13 = vpop.permute.xlu0 %4182  ;;  %v4193_v38 = vpop.permute.xlu1 %4192  ;;  %v4388_v45 = vld [vmem:[%s4528_s28 + $0x20] sm:$0xff]  ;;  %v4389_v26 = vld [vmem:[%s4528_s28 + $0x30] sm:$0xff] }
 0xb80   : > { %v4185_v25 = vunpack.i.h.bf16 %v4183_v13  ;;  %v4184_v18 = vunpack.i.l.bf16 %v4183_v13  ;;  %v4195_v51 = vunpack.i.h.bf16 %v4193_v38  ;;  %v4194_v10 = vunpack.i.l.bf16 %v4193_v38 }
 0xb81   : > { %4086 = vmatprep.mubr.msk.bf16.mxu0 %vm620_vm0, %v2940_v16 }
 0xb82   : > { %4087 = vmatmul.mubr.msk.bf16.vlgmr.msra.gmra.mrb[68].mxu0 %vm620_vm0, %v2941_v36  ;;  %v2928_v29 = vsel %vm1077_vm3, %v2920_v28, %v4185_v25  ;;  %v2927_v32 = vsel %vm1077_vm3, %v2919_v1, %v4184_v18  ;;  %v2930_v40 = vsel %vm1077_vm3, %v2922_v47, %v4195_v51  ;;  %v2929_v34 = vsel %vm1077_vm3, %v2921_v11, %v4194_v10  ;;  %v4390_v36 = vld [vmem:[%s4528_s28 + $0x28] sm:$0xff] }
 0xb83   : > { %v4198_v3 = vpop.permute.xlu0 %4197 }
 0xb84   : > { %v4200_v15 = vunpack.i.h.bf16 %v4198_v3  ;;  %v4199_v55 = vunpack.i.l.bf16 %v4198_v3 }
 0xb86   : > { %v2937_v30 = vsel %vm2931_vm4, %v2928_v29, %v4200_v15  ;;  %v2936_v46 = vsel %vm2931_vm4, %v2927_v32, %v4199_v55 }
 0xb87   : > { %v2942_v7 = vpack.c.bf16 %v2937_v30, %v2936_v46 }
 0xb89   : > { %4090 = vmatprep.mubr.msk.bf16.mxu0 %vm620_vm0, %v2942_v7 }
 0xbb8   : > { %v4203_v22 = vpop.permute.xlu1 %4202 }
 0xbb9   : > { %v4205_v52 = vunpack.i.h.bf16 %v4203_v22  ;;  %v4204_v35 = vunpack.i.l.bf16 %v4203_v22 }
 0xbbb   : > { %v2939_v21 = vsel %vm2931_vm4, %v2930_v40, %v4205_v52  ;;  %v2938_v57 = vsel %vm2931_vm4, %v2929_v34, %v4204_v35 }
 0xbbc   : > { %v2943_v44 = vpack.c.bf16 %v2939_v21, %v2938_v57  ;;  %v4214_v21 = vld [vmem:[%s5353_s12] sm:$0xff]   ;;  %v4215_v57 = vld [vmem:[%s5353_s12 + $0x8] sm:$0xff]  }
 0xbbd   : > { %4094 = vmatprep.subr.bf16.mxu1 %v4214_v21 }
 0xbbe   : > { %4091 = vmatmul.mubr.msk.bf16.gmra.mrb[72].mxu0 %vm620_vm0, %v2943_v44  ;;  %4095 = vmatpush3.bf16.msra.mxu1 %v4214_v21 }
 0xbbf   : > { %4096 = vmatprep.subr.bf16.mxu1 %v4215_v57 }
 0xbc2   : > { %4097 = vmatpush3.bf16.msra.mxu1 %v4215_v57 }
 0xc55   : > { %v4088_v8 = vpop.f32.mrb[68].mxu0 }
 0xc56   : > { %v3013_v14 = vpop.f32.mrb[69].mxu0  ;;  %v3022_v20 = vadd.f32 %v4088_v8, %v3717_v5 }
 0xc57   : > { %v3014_v56 = vadd.f32 %v3717_v5, %v3013_v14  ;;  %v4089_v48 = vpop.f32.mrb[70].mxu0 }
 0xc58   : > { %v3016_v53 = vpop.f32.mrb[71].mxu0  ;;  %v3046_v59 = vadd.f32 %v4385_v49, %v3022_v20  ;;  %v3025_v39 = vadd.f32 %v4089_v48, %v3717_v5 }
 0xc59   : > { %v3044_v4 = vadd.f32 %v4384_v58, %v3014_v56  ;;  %v3017_v0 = vadd.f32 %v3717_v5, %v3016_v53 }
 0xc5a   : > { %v3047_v33 = vadd.f32 %v4387_v31, %v3025_v39  ;;  %v3058_v60 = vsel %vm620_vm0, %v3046_v59, 0.0 }
 0xc5b   : > { %v3045_v17 = vadd.f32 %v4386_v19, %v3017_v0  ;;  %v3052_v23 = vsel %vm620_vm0, %v3044_v4, 0.0 }
 0xc5c   : > { %3053 = vadd.xlane.f32.xlu0 %v3052_v23  ;;  %v3061_v61 = vsel %vm620_vm0, %v3047_v33, 0.0 }
 0xc5d   : > { %v3055_v54 = vsel %vm620_vm0, %v3045_v17, 0.0 }
 0xc5e   : > { %3056 = vadd.xlane.f32.xlu1 %v3055_v54 }
 0xc60   : > { %3059 = vadd.xlane.f32.xlu0 %v3058_v60  ;;  %v4216_v60 = vld [vmem:[%s5355_s14] sm:$0xff]  }
 0xc61   : > { %4106 = vmatprep.subr.bf16.mxu0 %v4216_v60 }
 0xc62   : > { %4107 = vmatpush3.bf16.msra.mxu0 %v4216_v60 }
 0xc64   : > { %3062 = vadd.xlane.f32.xlu0 %v3061_v61  ;;  %v4217_v61 = vld [vmem:[%s5355_s14 + $0x8] sm:$0xff]  }
 0xc65   : > { %4108 = vmatprep.subr.bf16.mxu0 %v4217_v61 }
 0xc66   : > { %4109 = vmatpush3.bf16.msra.mxu0 %v4217_v61 }
 0xc91   : > { %v4092_v63 = vpop.f32.mrb[72].mxu0 }
 0xc92   : > { %v3038_v2 = vadd.f32 %v4092_v63, %v3717_v5  ;;  %v3029_v27 = vpop.f32.mrb[73].mxu0  ;;  %v4218_v63 = vld [vmem:[%s5355_s14 + $0x10] sm:$0xff]  }
 0xc93   : > { %v3030_v6 = vadd.f32 %v3717_v5, %v3029_v27  ;;  %v4093_v41 = vpop.f32.mrb[74].mxu0  ;;  %4110 = vmatprep.subr.bf16.mxu0 %v4218_v63  ;;  %v4220_v27 = vld [vmem:[%s5355_s14 + $0x20] sm:$0xff]  }
 0xc94   : > { %v3041_v50 = vadd.f32 %v4093_v41, %v3717_v5  ;;  %v3032_v37 = vpop.f32.mrb[75].mxu0  ;;  %v3050_v16 = vadd.f32 %v4389_v26, %v3038_v2  ;;  %v4219_v2 = vld [vmem:[%s5355_s14 + $0x18] sm:$0xff]   ;;  %4111 = vmatpush3.bf16.msra.mxu0 %v4218_v63 }
 0xc95   : > { %v3048_v9 = vadd.f32 %v4388_v45, %v3030_v6  ;;  %v3033_v43 = vadd.f32 %v3717_v5, %v3032_v37  ;;  %4112 = vmatprep.subr.bf16.mxu0 %v4219_v2  ;;  %v4221_v6 = vld [vmem:[%s5355_s14 + $0x28] sm:$0xff]  }
 0xc96   : > { %v3051_v25 = vadd.f32 %v4391_v12, %v3041_v50  ;;  %v3070_v3 = vsel %vm620_vm0, %v3050_v16, 0.0 }
 0xc97   : > { %v3049_v13 = vadd.f32 %v4390_v36, %v3033_v43  ;;  %v3064_v24 = vsel %vm620_vm0, %v3048_v9, 0.0 }
 0xc98   : > { %3065 = vadd.xlane.f32.xlu0 %v3064_v24  ;;  %v3073_v28 = vsel %vm620_vm0, %v3051_v25, 0.0  ;;  %4113 = vmatpush3.bf16.msra.mxu0 %v4219_v2 }
 0xc99   : > { %v3067_v18 = vsel %vm620_vm0, %v3049_v13, 0.0  ;;  %4114 = vmatprep.subr.bf16.mxu0 %v4220_v27 }
 0xc9a   : > { %3068 = vadd.xlane.f32.xlu1 %v3067_v18  ;;  %v3724_v18 = vld [vmem:[%s5351_s10] ss:$0 sm:$0xff] }
 0xc9c   : > { %3071 = vadd.xlane.f32.xlu0 %v3070_v3  ;;  %4115 = vmatpush3.bf16.msra.mxu0 %v4220_v27 }
 0xc9d   : > { %4116 = vmatprep.subr.bf16.mxu0 %v4221_v6 }
 0xc9e   : > { %3074 = vadd.xlane.f32.xlu1 %v3073_v28 }
 0xca0   : > { %4117 = vmatpush3.bf16.msra.mxu0 %v4221_v6  ;;  %v4223_v6 = vld [vmem:[%s5355_s14 + $0x38] sm:$0xff]  }
 0xce9   : > { %v3054_v1 = vpop.xlane.xlu0 %3053 }
 0xcea   : > { %v3077_v15 = vmul.f32 0.03125, %v3054_v1 }
 0xceb   : > { %v3057_v55 = vpop.xlane.xlu1 %3056 }
 0xcec   : > { %v5137_v29 = vsub.f32 %v3044_v4, %v3077_v15  ;;  %v3078_v32 = vmul.f32 0.03125, %v3057_v55 }
 0xced   : > { %v3060_v30 = vpop.xlane.xlu0 %3059 }
 0xcee   : > { %v5139_v46 = vsub.f32 %v3045_v17, %v3078_v32  ;;  %v3079_v7 = vmul.f32 0.03125, %v3060_v30  ;;  %v3093_v38 = vmul.f32 %v5137_v29, %v5137_v29  ;;  %v3725_v32 = vld [vmem:[%s5352_s11] ss:$0 sm:$0xff] }
 0xcf0   : > { %v5143_v42 = vsub.f32 %v3046_v59, %v3079_v7  ;;  %v3101_v62 = vsel %vm620_vm0, %v3093_v38, 0.0  ;;  %v3094_v51 = vmul.f32 %v5139_v46, %v5139_v46 }
 0xcf1   : > { %v3063_v10 = vpop.xlane.xlu0 %3062  ;;  %3102 = vadd.xlane.f32.xlu0 %v3101_v62 }
 0xcf2   : > { %v3080_v22 = vmul.f32 0.03125, %v3063_v10  ;;  %v3104_v47 = vsel %vm620_vm0, %v3094_v51, 0.0  ;;  %v3095_v11 = vmul.f32 %v5143_v42, %v5143_v42 }
 0xcf3   : > { %3105 = vadd.xlane.f32.xlu1 %v3104_v47 }
 0xcf4   : > { %v5151_v52 = vsub.f32 %v3047_v33, %v3080_v22  ;;  %v3107_v35 = vsel %vm620_vm0, %v3095_v11, 0.0 }
 0xcf5   : > { %3108 = vadd.xlane.f32.xlu0 %v3107_v35 }
 0xcf6   : > { %v3096_v40 = vmul.f32 %v5151_v52, %v5151_v52 }
 0xcf8   : > { %v3110_v34 = vsel %vm620_vm0, %v3096_v40, 0.0 }
 0xcf9   : > { %3111 = vadd.xlane.f32.xlu1 %v3110_v34 }
 0xd25   : > { %v3066_v44 = vpop.xlane.xlu0 %3065 }
 0xd26   : > { %v3081_v5 = vmul.f32 0.03125, %v3066_v44 }
 0xd27   : > { %v3069_v8 = vpop.xlane.xlu1 %3068 }
 0xd28   : > { %v5163_v14 = vsub.f32 %v3048_v9, %v3081_v5  ;;  %v3082_v20 = vmul.f32 0.03125, %v3069_v8 }
 0xd29   : > { %v3072_v56 = vpop.xlane.xlu0 %3071 }
 0xd2a   : > { %v5165_v48 = vsub.f32 %v3049_v13, %v3082_v20  ;;  %v3083_v53 = vmul.f32 0.03125, %v3072_v56  ;;  %v3097_v58 = vmul.f32 %v5163_v14, %v5163_v14 }
 0xd2b   : > { %v3075_v4 = vpop.xlane.xlu1 %3074 }
 0xd2c   : > { %v5169_v0 = vsub.f32 %v3050_v16, %v3083_v53  ;;  %v3084_v49 = vmul.f32 0.03125, %v3075_v4  ;;  %v3113_v59 = vsel %vm620_vm0, %v3097_v58, 0.0  ;;  %v3098_v39 = vmul.f32 %v5165_v48, %v5165_v48 }
 0xd2d   : > { %3114 = vadd.xlane.f32.xlu0 %v3113_v59 }
 0xd2e   : > { %v5174_v19 = vsub.f32 %v3051_v25, %v3084_v49  ;;  %v3116_v17 = vsel %vm620_vm0, %v3098_v39, 0.0  ;;  %v3099_v23 = vmul.f32 %v5169_v0, %v5169_v0 }
 0xd2f   : > { %3117 = vadd.xlane.f32.xlu1 %v3116_v17 }
 0xd30   : > { %v3119_v54 = vsel %vm620_vm0, %v3099_v23, 0.0  ;;  %v3100_v31 = vmul.f32 %v5174_v19, %v5174_v19 }
 0xd31   : > { %3120 = vadd.xlane.f32.xlu0 %v3119_v54 }
 0xd32   : > { %v3122_v33 = vsel %vm620_vm0, %v3100_v31, 0.0 }
 0xd33   : > { %3123 = vadd.xlane.f32.xlu1 %v3122_v33 }
 0xd7e   : > { %v3103_v41 = vpop.xlane.xlu0 %3102 }
 0xd7f   : > { %v3125_v50 = vmul.f32 0.03125, %v3103_v41  ;;  %v3726_v41 = vld [vmem:[%s5354_s13] ss:$0 sm:$0xff] }
 0xd80   : > { %v3106_v37 = vpop.xlane.xlu1 %3105 }
 0xd81   : > { %v3133_v45 = vadd.f32 1e-05, %v3125_v50  ;;  %v3126_v9 = vmul.f32 0.03125, %v3106_v37 }
 0xd82   : > { %v3109_v43 = vpop.xlane.xlu0 %3108 }
 0xd83   : > { %4352 = vrsqrt.f32 %v3133_v45  ;;  %v3134_v26 = vadd.f32 1e-05, %v3126_v9  ;;  %v3127_v16 = vmul.f32 0.03125, %v3109_v43 }
 0xd85   : > { %4354 = vrsqrt.f32 %v3134_v26  ;;  %v3135_v36 = vadd.f32 1e-05, %v3127_v16 }
 0xd86   : > { %v3112_v13 = vpop.xlane.xlu1 %3111 }
 0xd87   : > { %4356 = vrsqrt.f32 %v3135_v36  ;;  %v3128_v24 = vmul.f32 0.03125, %v3112_v13 }
 0xd89   : > { %v3136_v12 = vadd.f32 1e-05, %v3128_v24 }
 0xd8b   : > { %4358 = vrsqrt.f32 %v3136_v12 }
 0xd8d   : > { %v4353_v25 = vpop.eup %4352 }
 0xd8e   : > { %v3149_v3 = vmul.f32 %v4353_v25, %v5137_v29 }
 0xd8f   : > { %v4355_v28 = vpop.eup %4354 }
 0xd90   : > { %v3150_v1 = vmul.f32 %v4355_v28, %v5139_v46  ;;  %v3164_v15 = vmul.f32 %v3724_v18, %v3149_v3 }
 0xd91   : > { %v4357_v55 = vpop.eup %4356 }
 0xd92   : > { %v3151_v30 = vmul.f32 %v4357_v55, %v5143_v42  ;;  %v3165_v7 = vmul.f32 %v3724_v18, %v3150_v1  ;;  %v5210_v38 = vadd.f32 %v3725_v32, %v3164_v15 }
 0xd94   : > { %v5212_v62 = vadd.f32 %v3725_v32, %v3165_v7  ;;  %v3166_v10 = vmul.f32 %v3724_v18, %v3151_v30 }
 0xd95   : > { %v4359_v51 = vpop.eup %4358 }
 0xd96   : > { %v3152_v29 = vmul.f32 %v4359_v51, %v5151_v52  ;;  %v3187_v46 = vpack.c.bf16 %v5212_v62, %v5210_v38  ;;  %v5218_v47 = vadd.f32 %v3725_v32, %v3166_v10 }
 0xd98   : > { %v3167_v22 = vmul.f32 %v3724_v18, %v3152_v29  ;;  %4098 = vmatprep.mubr.msk.bf16.mxu1 %vm620_vm0, %v3187_v46 }
 0xd9a   : > { %v5220_v11 = vadd.f32 %v3725_v32, %v3167_v22 }
 0xd9c   : > { %v3188_v42 = vpack.c.bf16 %v5220_v11, %v5218_v47 }
 0xd9e   : > { %4099 = vmatmul.mubr.msk.bf16.vlgmr.msra.gmra.mrb[84].mxu1 %vm620_vm0, %v3188_v42 }
 0xdba   : > { %v3115_v35 = vpop.xlane.xlu0 %3114 }
 0xdbb   : > { %v3129_v40 = vmul.f32 0.03125, %v3115_v35 }
 0xdbc   : > { %v3118_v34 = vpop.xlane.xlu1 %3117 }
 0xdbd   : > { %v3137_v21 = vadd.f32 1e-05, %v3129_v40  ;;  %v3130_v52 = vmul.f32 0.03125, %v3118_v34  ;;  %v3733_v40 = vld [vmem:[%s5356_s15] ss:$0 sm:$0xff] }
 0xdbe   : > { %v3121_v57 = vpop.xlane.xlu0 %3120 }
 0xdbf   : > { %4360 = vrsqrt.f32 %v3137_v21  ;;  %v3138_v44 = vadd.f32 1e-05, %v3130_v52  ;;  %v3131_v5 = vmul.f32 0.03125, %v3121_v57 }
 0xdc0   : > { %v3124_v8 = vpop.xlane.xlu1 %3123 }
 0xdc1   : > { %4362 = vrsqrt.f32 %v3138_v44  ;;  %v3139_v20 = vadd.f32 1e-05, %v3131_v5  ;;  %v3132_v56 = vmul.f32 0.03125, %v3124_v8 }
 0xdc3   : > { %4364 = vrsqrt.f32 %v3139_v20  ;;  %v3140_v53 = vadd.f32 1e-05, %v3132_v56 }
 0xdc5   : > { %4366 = vrsqrt.f32 %v3140_v53 }
 0xdc9   : > { %v4361_v58 = vpop.eup %4360 }
 0xdca   : > { %v3153_v4 = vmul.f32 %v4361_v58, %v5163_v14 }
 0xdcb   : > { %v4363_v49 = vpop.eup %4362 }
 0xdcc   : > { %v3154_v59 = vmul.f32 %v4363_v49, %v5165_v48  ;;  %v3168_v39 = vmul.f32 %v3724_v18, %v3153_v4 }
 0xdcd   : > { %v4365_v17 = vpop.eup %4364 }
 0xdce   : > { %v3155_v23 = vmul.f32 %v4365_v17, %v5169_v0  ;;  %v3169_v54 = vmul.f32 %v3724_v18, %v3154_v59  ;;  %v5229_v60 = vadd.f32 %v3725_v32, %v3168_v39 }
 0xdcf   : > { %v4367_v31 = vpop.eup %4366 }
 0xdd0   : > { %v3156_v33 = vmul.f32 %v4367_v31, %v5174_v19  ;;  %v5231_v61 = vadd.f32 %v3725_v32, %v3169_v54  ;;  %v3170_v63 = vmul.f32 %v3724_v18, %v3155_v23  ;;  %v4222_v19 = vld [vmem:[%s5355_s14 + $0x30] sm:$0xff]  }
 0xdd1   : > { %4118 = vmatprep.subr.bf16.mxu0 %v4222_v19 }
 0xdd2   : > { %v3189_v2 = vpack.c.bf16 %v5231_v61, %v5229_v60  ;;  %v3171_v14 = vmul.f32 %v3724_v18, %v3156_v33  ;;  %v5235_v27 = vadd.f32 %v3725_v32, %v3170_v63  ;;  %4119 = vmatpush3.bf16.msra.mxu0 %v4222_v19 }
 0xdd3   : > { %4120 = vmatprep.subr.bf16.mxu0 %v4223_v6 }
 0xdd4   : > { %4102 = vmatprep.mubr.msk.bf16.mxu1 %vm620_vm0, %v3189_v2  ;;  %v5238_v48 = vadd.f32 %v3725_v32, %v3171_v14 }
 0xdd6   : > { %v3190_v0 = vpack.c.bf16 %v5238_v48, %v5235_v27  ;;  %4121 = vmatpush3.bf16.msra.mxu0 %v4223_v6 }
 0xdd8   : > { %4103 = vmatmul.mubr.msk.bf16.gmra.mrb[88].mxu1 %vm620_vm0, %v3190_v0 }
 0xe71   : > { %v4100_v50 = vpop.f32.mrb[84].mxu1 }
 0xe72   : > { %v3269_v37 = vadd.f32 %v4100_v50, %v3726_v41  ;;  %v3260_v45 = vpop.f32.mrb[85].mxu1 }
 0xe73   : > { %v3261_v9 = vadd.f32 %v3726_v41, %v3260_v45  ;;  %v4101_v43 = vpop.f32.mrb[86].mxu1 }
 0xe74   : > { %v3272_v26 = vadd.f32 %v4101_v43, %v3726_v41  ;;  %v3263_v16 = vpop.f32.mrb[87].mxu1  ;;  %v3293_v13 = vmax.f32 %v3269_v37, 0.0 }
 0xe75   : > { %v3264_v36 = vadd.f32 %v3726_v41, %v3263_v16  ;;  %v3291_v12 = vmax.f32 %v3261_v9, 0.0 }
 0xe76   : > { %v3294_v24 = vmax.f32 %v3272_v26, 0.0 }
 0xe77   : > { %v3292_v25 = vmax.f32 %v3264_v36, 0.0 }
 0xe78   : > { %v3300_v18 = vpack.c.bf16 %v3294_v24, %v3293_v13 }
 0xe79   : > { %v3299_v3 = vpack.c.bf16 %v3292_v25, %v3291_v12 }
 0xe7b   : > { %4122 = vmatprep.mubr.bf16.mxu0 %v3299_v3 }
 0xe7c   : > { %4123 = vmatmul.mubr.bf16.vlgmr.msra.gmra.mrb[76].mxu0 %v3300_v18 }
 0xeab   : > { %v4104_v28 = vpop.f32.mrb[88].mxu1 }
 0xeac   : > { %v3285_v1 = vadd.f32 %v4104_v28, %v3726_v41  ;;  %v3276_v15 = vpop.f32.mrb[89].mxu1 }
 0xead   : > { %v3277_v55 = vadd.f32 %v3726_v41, %v3276_v15  ;;  %v4105_v32 = vpop.f32.mrb[90].mxu1 }
 0xeae   : > { %v3288_v30 = vadd.f32 %v4105_v32, %v3726_v41  ;;  %v3279_v7 = vpop.f32.mrb[91].mxu1  ;;  %v3297_v10 = vmax.f32 %v3285_v1, 0.0 }
 0xeaf   : > { %v3280_v51 = vadd.f32 %v3726_v41, %v3279_v7  ;;  %v3295_v46 = vmax.f32 %v3277_v55, 0.0 }
 0xeb0   : > { %v3298_v29 = vmax.f32 %v3288_v30, 0.0 }
 0xeb1   : > { %v3296_v22 = vmax.f32 %v3280_v51, 0.0 }
 0xeb2   : > { %v3302_v42 = vpack.c.bf16 %v3298_v29, %v3297_v10 }
 0xeb3   : > { %v3301_v35 = vpack.c.bf16 %v3296_v22, %v3295_v46 }
 0xeb5   : > { %4126 = vmatprep.mubr.bf16.mxu0 %v3301_v35 }
 0xeb6   : > { %4127 = vmatmul.mubr.bf16.gmra.mrb[80].mxu0 %v3302_v42 }
 0xf4f   : > { %v4124_v34 = vpop.f32.mrb[76].mxu0 }
 0xf50   : > { %v3417_v21 = vadd.f32 %v4124_v34, %v3733_v40  ;;  %v3408_v52 = vpop.f32.mrb[77].mxu0 }
 0xf51   : > { %v3409_v57 = vadd.f32 %v3733_v40, %v3408_v52  ;;  %v4125_v44 = vpop.f32.mrb[78].mxu0 }
 0xf52   : > { %v3441_v5 = vadd.f32 %v3417_v21, %v5218_v47  ;;  %v3420_v8 = vadd.f32 %v4125_v44, %v3733_v40  ;;  %v3411_v20 = vpop.f32.mrb[79].mxu0 }
 0xf53   : > { %v3412_v56 = vadd.f32 %v3733_v40, %v3411_v20  ;;  %v3439_v53 = vadd.f32 %v3409_v57, %v5210_v38 }
 0xf54   : > { %v3442_v58 = vadd.f32 %v3420_v8, %v5220_v11  ;;  %v3453_v4 = vsel %vm620_vm0, %v3441_v5, 0.0 }
 0xf55   : > { %3454 = vadd.xlane.f32.xlu0 %v3453_v4  ;;  %v3440_v49 = vadd.f32 %v3412_v56, %v5212_v62  ;;  %v3447_v39 = vsel %vm620_vm0, %v3439_v53, 0.0 }
 0xf56   : > { %v3456_v59 = vsel %vm620_vm0, %v3442_v58, 0.0 }
 0xf57   : > { %3457 = vadd.xlane.f32.xlu1 %v3456_v59  ;;  %v3450_v47 = vsel %vm620_vm0, %v3440_v49, 0.0 }
 0xf59   : > { %3448 = vadd.xlane.f32.xlu0 %v3447_v39 }
 0xf5b   : > { %3451 = vadd.xlane.f32.xlu1 %v3450_v47 }
 0xf89   : > { %v4128_v17 = vpop.f32.mrb[80].mxu0 }
 0xf8a   : > { %v3424_v23 = vpop.f32.mrb[81].mxu0  ;;  %v3433_v54 = vadd.f32 %v4128_v17, %v3733_v40 }
 0xf8b   : > { %v3425_v38 = vadd.f32 %v3733_v40, %v3424_v23  ;;  %v4129_v31 = vpop.f32.mrb[82].mxu0 }
 0xf8c   : > { %v3436_v11 = vadd.f32 %v4129_v31, %v3733_v40  ;;  %v3427_v33 = vpop.f32.mrb[83].mxu0  ;;  %v3445_v62 = vadd.f32 %v3433_v54, %v5235_v27 }
 0xf8d   : > { %v3443_v63 = vadd.f32 %v3425_v38, %v5229_v60  ;;  %v3428_v2 = vadd.f32 %v3733_v40, %v3427_v33 }
 0xf8e   : > { %v3446_v19 = vadd.f32 %v3436_v11, %v5238_v48  ;;  %v3465_v41 = vsel %vm620_vm0, %v3445_v62, 0.0 }
 0xf8f   : > { %v3444_v14 = vadd.f32 %v3428_v2, %v5231_v61  ;;  %v3459_v0 = vsel %vm620_vm0, %v3443_v63, 0.0 }
 0xf90   : > { %3460 = vadd.xlane.f32.xlu0 %v3459_v0  ;;  %v3468_v50 = vsel %vm620_vm0, %v3446_v19, 0.0 }
 0xf91   : > { %v3462_v6 = vsel %vm620_vm0, %v3444_v14, 0.0 }
 0xf92   : > { %3463 = vadd.xlane.f32.xlu1 %v3462_v6  ;;  %v3743_v6 = vld [vmem:[%s5358_s17] ss:$0 sm:$0xff] }
 0xf94   : > { %3466 = vadd.xlane.f32.xlu0 %v3465_v41 }
 0xf96   : > { %3469 = vadd.xlane.f32.xlu1 %v3468_v50 }
 0xfe2   : > { %v3455_v60 = vpop.xlane.xlu0 %3454 }
 0xfe3   : > { %v3473_v37 = vmul.f32 0.03125, %v3455_v60 }
 0xfe4   : > { %v3458_v45 = vpop.xlane.xlu1 %3457 }
 0xfe5   : > { %v5271_v27 = vsub.f32 %v3441_v5, %v3473_v37  ;;  %v3474_v61 = vmul.f32 0.03125, %v3458_v45 }
 0xfe6   : > { %v3449_v9 = vpop.xlane.xlu0 %3448 }
 0xfe7   : > { %v5273_v43 = vsub.f32 %v3442_v58, %v3474_v61  ;;  %v3471_v26 = vmul.f32 0.03125, %v3449_v9  ;;  %v3489_v48 = vmul.f32 %v5271_v27, %v5271_v27 }
 0xfe8   : > { %v3452_v16 = vpop.xlane.xlu1 %3451 }
 0xfe9   : > { %v3479_v36 = vsub.f32 %v3439_v53, %v3471_v26  ;;  %v3472_v13 = vmul.f32 0.03125, %v3452_v16  ;;  %v3501_v24 = vsel %vm620_vm0, %v3489_v48, 0.0  ;;  %v3490_v12 = vmul.f32 %v5273_v43, %v5273_v43 }
 0xfea   : > { %3502 = vadd.xlane.f32.xlu0 %v3501_v24 }
 0xfeb   : > { %v3480_v25 = vsub.f32 %v3440_v49, %v3472_v13  ;;  %v3504_v18 = vsel %vm620_vm0, %v3490_v12, 0.0  ;;  %v3487_v3 = vmul.f32 %v3479_v36, %v3479_v36 }
 0xfec   : > { %3505 = vadd.xlane.f32.xlu1 %v3504_v18 }
 0xfed   : > { %v3495_v28 = vsel %vm620_vm0, %v3487_v3, 0.0  ;;  %v3488_v1 = vmul.f32 %v3480_v25, %v3480_v25 }
 0xfee   : > { %3496 = vadd.xlane.f32.xlu0 %v3495_v28 }
 0xfef   : > { %v3498_v15 = vsel %vm620_vm0, %v3488_v1, 0.0 }
 0xff0   : > { %3499 = vadd.xlane.f32.xlu1 %v3498_v15 }
0x101d   : > { %v3461_v55 = vpop.xlane.xlu0 %3460 }
0x101e   : > { %v3475_v32 = vmul.f32 0.03125, %v3461_v55 }
0x101f   : > { %v3464_v30 = vpop.xlane.xlu1 %3463 }
0x1020   : > { %v5283_v7 = vsub.f32 %v3443_v63, %v3475_v32  ;;  %v3476_v51 = vmul.f32 0.03125, %v3464_v30  ;;  %v3742_v63 = vld [vmem:[%s5357_s16] ss:$0 sm:$0xff] }
0x1021   : > { %v3467_v10 = vpop.xlane.xlu0 %3466 }
0x1022   : > { %v5285_v29 = vsub.f32 %v3444_v14, %v3476_v51  ;;  %v3477_v46 = vmul.f32 0.03125, %v3467_v10  ;;  %v3491_v22 = vmul.f32 %v5283_v7, %v5283_v7 }
0x1023   : > { %v3470_v42 = vpop.xlane.xlu1 %3469 }
0x1024   : > { %v5289_v35 = vsub.f32 %v3445_v62, %v3477_v46  ;;  %v3478_v40 = vmul.f32 0.03125, %v3470_v42  ;;  %v3507_v34 = vsel %vm620_vm0, %v3491_v22, 0.0  ;;  %v3492_v21 = vmul.f32 %v5285_v29, %v5285_v29 }
0x1025   : > { %3508 = vadd.xlane.f32.xlu0 %v3507_v34 }
0x1026   : > { %v5294_v52 = vsub.f32 %v3446_v19, %v3478_v40  ;;  %v3510_v57 = vsel %vm620_vm0, %v3492_v21, 0.0  ;;  %v3493_v44 = vmul.f32 %v5289_v35, %v5289_v35 }
0x1027   : > { %3511 = vadd.xlane.f32.xlu1 %v3510_v57 }
0x1028   : > { %v3513_v5 = vsel %vm620_vm0, %v3493_v44, 0.0  ;;  %v3494_v8 = vmul.f32 %v5294_v52, %v5294_v52 }
0x1029   : > { %3514 = vadd.xlane.f32.xlu0 %v3513_v5 }
0x102a   : > { %v3516_v20 = vsel %vm620_vm0, %v3494_v8, 0.0 }
0x102b   : > { %3517 = vadd.xlane.f32.xlu1 %v3516_v20 }
0x1077   : > { %v3503_v56 = vpop.xlane.xlu0 %3502 }
0x1078   : > { %v3521_v53 = vmul.f32 0.03125, %v3503_v56 }
0x1079   : > { %v3506_v58 = vpop.xlane.xlu1 %3505 }
0x107a   : > { %v3529_v4 = vadd.f32 1e-05, %v3521_v53  ;;  %v3522_v49 = vmul.f32 0.03125, %v3506_v58 }
0x107b   : > { %v3497_v59 = vpop.xlane.xlu0 %3496 }
0x107c   : > { %4368 = vrsqrt.f32 %v3529_v4  ;;  %v3530_v39 = vadd.f32 1e-05, %v3522_v49  ;;  %v3519_v47 = vmul.f32 0.03125, %v3497_v59 }
0x107d   : > { %v3500_v17 = vpop.xlane.xlu1 %3499 }
0x107e   : > { %4370 = vrsqrt.f32 %v3530_v39  ;;  %v3527_v23 = vadd.f32 1e-05, %v3519_v47  ;;  %v3520_v54 = vmul.f32 0.03125, %v3500_v17 }
0x1080   : > { %4372 = vrsqrt.f32 %v3527_v23  ;;  %v3528_v38 = vadd.f32 1e-05, %v3520_v54 }
0x1082   : > { %4374 = vrsqrt.f32 %v3528_v38 }
0x1086   : > { %v4369_v31 = vpop.eup %4368 }
0x1087   : > { %v3545_v33 = vmul.f32 %v4369_v31, %v5271_v27 }
0x1088   : > { %v4371_v11 = vpop.eup %4370 }
0x1089   : > { %v3546_v62 = vmul.f32 %v4371_v11, %v5273_v43  ;;  %v3560_v19 = vmul.f32 %v3742_v63, %v3545_v33 }
0x108a   : > { %v4373_v2 = vpop.eup %4372 }
0x108b   : > { %v3543_v14 = vmul.f32 %v4373_v2, %v3479_v36  ;;  %v3561_v60 = vmul.f32 %v3742_v63, %v3546_v62  ;;  %v3575_v27 = vadd.f32 %v3743_v6, %v3560_v19 }
0x108c   : > { %v4375_v0 = vpop.eup %4374 }
0x108d   : > { %v3558_v41 = vmul.f32 %v3742_v63, %v3543_v14  ;;  %v3544_v50 = vmul.f32 %v4375_v0, %v3480_v25  ;;  %v3576_v9 = vadd.f32 %v3743_v6, %v3561_v60  ;;  %3583 = vst.msk [vmem:[%s5316_s25 + $0x10] sm:$0xff] %vm620_vm0, %v3575_v27 }
0x108f   : > { %v3573_v37 = vadd.f32 %v3743_v6, %v3558_v41  ;;  %v3559_v45 = vmul.f32 %v3742_v63, %v3544_v50  ;;  %3584 = vst.msk [vmem:[%s5316_s25 + $0x18] sm:$0xff] %vm620_vm0, %v3576_v9 }
0x1091   : > { %3581 = vst.msk [vmem:[%s5316_s25] sm:$0xff] %vm620_vm0, %v3573_v37  ;;  %v3574_v61 = vadd.f32 %v3743_v6, %v3559_v45 }
0x1093   : > { %3582 = vst.msk [vmem:[%s5316_s25 + $0x8] sm:$0xff] %vm620_vm0, %v3574_v61 }
0x10b2   : > { %v3509_v43 = vpop.xlane.xlu0 %3508 }
0x10b3   : > { %v3523_v26 = vmul.f32 0.03125, %v3509_v43 }
0x10b4   : > { %v3512_v48 = vpop.xlane.xlu1 %3511 }
0x10b5   : > { %v3531_v16 = vadd.f32 1e-05, %v3523_v26  ;;  %v3524_v36 = vmul.f32 0.03125, %v3512_v48 }
0x10b6   : > { %v3515_v13 = vpop.xlane.xlu0 %3514 }
0x10b7   : > { %4376 = vrsqrt.f32 %v3531_v16  ;;  %v3532_v24 = vadd.f32 1e-05, %v3524_v36  ;;  %v3525_v12 = vmul.f32 0.03125, %v3515_v13 }
0x10b8   : > { %v3518_v25 = vpop.xlane.xlu1 %3517 }
0x10b9   : > { %4378 = vrsqrt.f32 %v3532_v24  ;;  %v3533_v18 = vadd.f32 1e-05, %v3525_v12  ;;  %v3526_v3 = vmul.f32 0.03125, %v3518_v25 }
0x10bb   : > { %4380 = vrsqrt.f32 %v3533_v18  ;;  %v3534_v28 = vadd.f32 1e-05, %v3526_v3 }
0x10bd   : > { %4382 = vrsqrt.f32 %v3534_v28 }
0x10c1   : > { %v4377_v1 = vpop.eup %4376 }
0x10c2   : > { %v3547_v15 = vmul.f32 %v4377_v1, %v5283_v7 }
0x10c3   : > { %v4379_v55 = vpop.eup %4378 }
0x10c4   : > { %v3562_v32 = vmul.f32 %v3742_v63, %v3547_v15  ;;  %v3548_v30 = vmul.f32 %v4379_v55, %v5285_v29 }
0x10c5   : > { %v4381_v51 = vpop.eup %4380 }
0x10c6   : > { %v3577_v10 = vadd.f32 %v3743_v6, %v3562_v32  ;;  %v3563_v46 = vmul.f32 %v3742_v63, %v3548_v30  ;;  %v3549_v22 = vmul.f32 %v4381_v51, %v5289_v35 }
0x10c7   : > { %v4383_v42 = vpop.eup %4382 }
0x10c8   : > { %3585 = vst.msk [vmem:[%s5316_s25 + $0x20] sm:$0xff] %vm620_vm0, %v3577_v10  ;;  %v3578_v40 = vadd.f32 %v3743_v6, %v3563_v46  ;;  %v3564_v34 = vmul.f32 %v3742_v63, %v3549_v22  ;;  %v3550_v21 = vmul.f32 %v4383_v42, %v5294_v52 }
0x10ca   : > { %3586 = vst.msk [vmem:[%s5316_s25 + $0x28] sm:$0xff] %vm620_vm0, %v3578_v40  ;;  %v3579_v7 = vadd.f32 %v3743_v6, %v3564_v34  ;;  %v3565_v57 = vmul.f32 %v3742_v63, %v3550_v21 }
0x10cc   : > { %3587 = vst.msk [vmem:[%s5316_s25 + $0x30] sm:$0xff] %vm620_vm0, %v3579_v7  ;;  %v3580_v44 = vadd.f32 %v3743_v6, %v3565_v57 }
0x10ce   : > { %3588 = vst.msk [vmem:[%s5316_s25 + $0x38] sm:$0xff] %vm620_vm0, %v3580_v44 }
0x10cf PF: > { %s28_s27 = sadd.s32 1, %s4398_s27  }
0x10d0   : > { %p25_p4 = scmp.ge.s32.totalorder %s28_s27, 4  }
0x10d2   :  { %27 = sbr.rel (!%p25_p4) target bundleno = 4 (0x4), region = 125 }

</bundles_post_ra>
